<compile_context>
chip_gen: v6e
topology: v6e:2x2x1
jax: 0.10.0
libtpu: 0.0.40
codegen_flags: <defaults>
</compile_context>

<pallas_src>
import math
import functools

import jax
import jax.numpy as jnp
from jax.experimental import pallas as pl
from jax.experimental.pallas import tpu as pltpu


def _pair(v):
    return (v, v) if isinstance(v, int) else tuple(v)


# ----------------------------------------------------------------------------
# "SAME"-style padding computation (faithful to the torch helper, which uses
# stride[0] / dilation[0] for BOTH spatial dims and ignores the user `padding`).
# ----------------------------------------------------------------------------
def _same_pads(H, W, KH, KW, s0, d0):
    out_rows = (H + s0 - 1) // s0
    padding_rows = max(0, (out_rows - 1) * s0 + (KH - 1) * d0 + 1 - H)
    rows_odd = padding_rows % 2
    out_cols = (W + s0 - 1) // s0
    padding_cols = max(0, (out_cols - 1) * s0 + (KW - 1) * d0 + 1 - W)
    cols_odd = padding_cols % 2
    return (padding_rows // 2, padding_rows // 2 + rows_odd,
            padding_cols // 2, padding_cols // 2 + cols_odd)


# ----------------------------------------------------------------------------
# Pallas kernel: fused-im2col conv for one image.
#   x_ref: (P, Cin)          f32  padded image, NHWC flattened with row pitch Wp
#   w_ref: (KH*KW, Cin, Cp)  bf16 one (Cin, Cp) weight slab per kernel tap
#   b_ref: (1, Cp)           f32  bias (zero-padded to the lane-dense Cp)
#   o_ref: (M, Cp)           f32  dense (stride-1) output, row pitch Wp
# ----------------------------------------------------------------------------
def _conv_taps_kernel(x_ref, w_ref, b_ref, o_ref, *, taps, m_rows, cout_p):
    # Initialize the (VMEM-resident) output block with the broadcast bias, then
    # accumulate one bf16 MXU matmul per kernel tap in f32.
    o_ref[...] = jnp.broadcast_to(b_ref[...], (m_rows, cout_p))
    for t, off in enumerate(taps):
        # Static contiguous slice of the resident image (tap offset is static).
        lhs = x_ref[off:off + m_rows, :].astype(jnp.bfloat16)
        o_ref[...] += jnp.dot(lhs, w_ref[t],
                              preferred_element_type=jnp.float32)


def conv2d_same_padding(x, weight, bias=None, stride=(1, 1), padding=(1, 1),
                        dilation=(1, 1), groups=1):
    """JAX/Pallas equivalent of helper.conv2d_same_padding.

    x: (N, Cin, H, W), weight: (Cout, Cin//groups, KH, KW), bias: (Cout,) or None.
    Like the torch helper, `padding` is ignored (overridden by SAME padding) and
    the SAME computation uses stride[0]/dilation[0] for both spatial dims.
    """
    if groups != 1:
        # TODO(synk): grouped / depthwise convolution not implemented in Pallas path.
        raise NotImplementedError("groups != 1 not supported")
    stride, dilation = _pair(stride), _pair(dilation)
    del padding  # overridden by the computed SAME padding (faithful to torch helper)

    N, Cin, H, W = x.shape
    Cout, _, KH, KW = weight.shape
    sH, sW = stride
    dH, dW = dilation

    pad_t, pad_b, pad_l, pad_r = _same_pads(H, W, KH, KW, stride[0], dilation[0])
    Hp, Wp = H + pad_t + pad_b, W + pad_l + pad_r
    Ho = (Hp - dH * (KH - 1) - 1) // sH + 1
    Wo = (Wp - dW * (KW - 1) - 1) // sW + 1

    # The kernel computes the dense (stride-1) output; strides are applied by a
    # cheap strided slice on the small output afterwards.
    # TODO(synk): for stride > 1 this does sH*sW more MXU work than strictly needed.
    Ho1 = Hp - dH * (KH - 1)
    Wo1 = Wp - dW * (KW - 1)
    M1 = Ho1 * Wp                      # dense output rows (row pitch Wp)
    extra = (KW - 1) * dW              # tail pad so every tap slice stays in bounds
    P = Hp * Wp + extra
    Cout_p = ((Cout + 127) // 128) * 128   # lane-dense output / full MXU N dim

    # --- O(input) prep (XLA fuses pad + transpose + reshape into one copy) ----
    xp = jnp.pad(x, ((0, 0), (0, 0), (pad_t, pad_b), (pad_l, pad_r)))
    x_flat = jnp.transpose(xp, (0, 2, 3, 1)).reshape(N, Hp * Wp, Cin)
    if extra:
        x_flat = jnp.pad(x_flat, ((0, 0), (0, extra), (0, 0)))
    # Kept f32 in HBM/VMEM (read exactly once); slices are cast to bf16 in-kernel
    # right before the MXU, so the matmul itself runs bf16 x bf16 -> f32.
    x_flat = x_flat.astype(jnp.float32)

    # weight (Cout, Cin, KH, KW) -> (KH*KW, Cin, Cout_p), bf16 for the MXU.
    w = jnp.transpose(weight, (2, 3, 1, 0)).reshape(KH * KW, Cin, Cout)
    if Cout_p != Cout:
        w = jnp.pad(w, ((0, 0), (0, 0), (0, Cout_p - Cout)))
    w = w.astype(jnp.bfloat16)

    if bias is None:
        b_row = jnp.zeros((1, Cout_p), jnp.float32)
    else:
        b_row = jnp.pad(bias.astype(jnp.float32).reshape(1, Cout),
                        ((0, 0), (0, Cout_p - Cout)))

    # Flat tap offsets, matching the (kh, kw) ordering of the weight reshape.
    taps = tuple(kh * dH * Wp + kw * dW
                 for kh in range(KH) for kw in range(KW))

    kernel = functools.partial(_conv_taps_kernel, taps=taps,
                               m_rows=M1, cout_p=Cout_p)

    out = pl.pallas_call(
        kernel,
        out_shape=jax.ShapeDtypeStruct((N, M1, Cout_p), jnp.float32),
        grid_spec=pltpu.PrefetchScalarGridSpec(
            num_scalar_prefetch=0,
            grid=(N,),                                   # one image per step
            in_specs=[
                # Whole padded image resident in VMEM for this grid step
                # (read from HBM exactly once -- no im2col patch matrix).
                pl.BlockSpec((None, P, Cin), lambda n: (n, 0, 0)),
                # Full weight / bias, constant across the grid (loaded once).
                pl.BlockSpec((KH * KW, Cin, Cout_p), lambda n: (0, 0, 0)),
                pl.BlockSpec((1, Cout_p), lambda n: (0, 0)),
            ],
            out_specs=pl.BlockSpec((None, M1, Cout_p), lambda n: (n, 0, 0)),
        ),
        compiler_params=pltpu.CompilerParams(
            dimension_semantics=("parallel",),    # megacore sharding on v7x
            vmem_limit_bytes=48 * 1024 * 1024),   # above v5e's 16 MiB default
        # TODO(synk): for images whose padded NHWC plane does not fit VMEM,
        # add an output-row-block grid axis (input slab per row block + halo).
    )(x_flat, w, b_row)

    # (N, M1, Cp) -> (N, Ho1, Wp, Cp) -> apply stride, drop wrapped columns and
    # padded channels -> NCHW.  O(output) work, fused by XLA with the transpose.
    out = out.reshape(N, Ho1, Wp, Cout_p)
    out = out[:, :(Ho - 1) * sH + 1:sH, :(Wo - 1) * sW + 1:sW, :Cout]
    return jnp.transpose(out, (0, 3, 1, 2)).astype(x.dtype)


# ----------------------------------------------------------------------------
# Module wrapper with deterministic parameter init (mirrors _ConvNd.reset_parameters)
# ----------------------------------------------------------------------------
class Conv2d:
    def __init__(self, in_channels, out_channels, kernel_size, stride=1,
                 padding=0, dilation=1, groups=1, bias=True, *, key):
        self.in_channels = in_channels
        self.out_channels = out_channels
        self.kernel_size = _pair(kernel_size)
        self.stride = _pair(stride)
        self.padding = _pair(padding)
        self.dilation = _pair(dilation)
        self.groups = groups

        n = in_channels
        for k in self.kernel_size:
            n *= k
        stdv = 1.0 / math.sqrt(n)

        wkey, bkey = jax.random.split(key)
        self.weight = jax.random.uniform(
            wkey,
            (out_channels, in_channels // groups, *self.kernel_size),
            minval=-stdv, maxval=stdv, dtype=jnp.float32)
        if bias:
            self.bias = jax.random.uniform(
                bkey, (out_channels,), minval=-stdv, maxval=stdv,
                dtype=jnp.float32)
        else:
            self.bias = None

    def __call__(self, x):
        return conv2d_same_padding(x, self.weight, self.bias, self.stride,
                                   self.padding, self.dilation, self.groups)


# ----------------------------------------------------------------------------
# Demo / self-check
# ----------------------------------------------------------------------------
if __name__ == "__main__":
    key = jax.random.PRNGKey(0)
    xkey, pkey = jax.random.split(key)

    N, Cin, H, W = 2, 4, 16, 16
    Cout, K = 8, 3

    x = jax.random.normal(xkey, (N, Cin, H, W), dtype=jnp.float32)
    conv = Conv2d(Cin, Cout, kernel_size=K, stride=1, padding=1, key=pkey)

    y = jax.block_until_ready(conv(x))

    # Reference: lax conv with the same explicit SAME padding.  Operands are
    # rounded to bf16 to match the kernel's MXU numerics (f32 accumulation).
    pad_t, pad_b, pad_l, pad_r = _same_pads(H, W, K, K,
                                            conv.stride[0], conv.dilation[0])
    xr = x.astype(jnp.bfloat16).astype(jnp.float32)
    wr = conv.weight.astype(jnp.bfloat16).astype(jnp.float32)
    y_ref = jax.lax.conv_general_dilated(
        xr, wr,
        window_strides=conv.stride,
        padding=[(pad_t, pad_b), (pad_l, pad_r)],
        rhs_dilation=conv.dilation,
        dimension_numbers=("NCHW", "OIHW", "NCHW"),
        precision=jax.lax.Precision.HIGHEST,
    ) + conv.bias[None, :, None, None]

    assert y.shape == (N, Cout, H, W), y.shape
    max_err = float(jnp.max(jnp.abs(y - y_ref)))
    assert jnp.allclose(y, y_ref, atol=1e-2, rtol=1e-2), max_err

    print("KERNEL_OK")
</pallas_src>

<mosaic_0001>
module attributes {stable_mosaic.version = 11 : i64} {
  func.func @_conv_taps_kernel(%arg0: i32, %arg1: memref<1x326x4xf32, #tpu.memory_space<vmem>>, %arg2: memref<9x4x128xbf16, #tpu.memory_space<vmem>>, %arg3: memref<1x128xf32, #tpu.memory_space<vmem>>, %arg4: memref<1x288x128xf32, #tpu.memory_space<vmem>>) attributes {dimension_semantics = [#tpu.dimension_semantics<parallel>], iteration_bounds = array<i64: 2>, scalar_prefetch = 0 : i64, scratch_operands = 0 : i64, tpu.core_type = #tpu.core_type<tc>, window_params = [{transform_indices = @transform_0, window_bounds = array<i64: 1, 326, 4>}, {pipeline_mode = #tpu.pipeline_mode<synchronous>, transform_indices = @transform_1, window_bounds = array<i64: 9, 4, 128>}, {pipeline_mode = #tpu.pipeline_mode<synchronous>, transform_indices = @transform_2, window_bounds = array<i64: 1, 128>}, {transform_indices = @transform_3, window_bounds = array<i64: 1, 288, 128>}]} {
    %c0 = arith.constant 0 : index
    %c0_0 = arith.constant 0 : index
    %0 = vector.load %arg3[%c0, %c0_0] : memref<1x128xf32, #tpu.memory_space<vmem>>, vector<1x128xf32>
    %1 = vector.shape_cast %0 : vector<1x128xf32> to vector<1x128xf32>
    %2 = vector.broadcast %1 : vector<1x128xf32> to vector<288x128xf32>
    %c0_1 = arith.constant 0 : index
    %c0_2 = arith.constant 0 : index
    %c0_3 = arith.constant 0 : index
    %3 = vector.load %arg4[%c0_1, %c0_2, %c0_3] : memref<1x288x128xf32, #tpu.memory_space<vmem>>, vector<1x288x128xf32>
    %4 = vector.shape_cast %3 : vector<1x288x128xf32> to vector<288x128xf32>
    %5 = vector.shape_cast %2 : vector<288x128xf32> to vector<1x288x128xf32>
    tpu.vector_store %arg4[%c0_1, %c0_2, %c0_3], %5 {strides = array<i32>} : memref<1x288x128xf32, #tpu.memory_space<vmem>>, vector<1x288x128xf32>,
    %c0_4 = arith.constant 0 : index
    %c0_5 = arith.constant 0 : index
    %c0_6 = arith.constant 0 : index
    %6 = vector.load %arg1[%c0_4, %c0_5, %c0_6] : memref<1x326x4xf32, #tpu.memory_space<vmem>>, vector<1x288x4xf32>
    %7 = vector.shape_cast %6 : vector<1x288x4xf32> to vector<288x4xf32>
    %8 = arith.truncf %7 : vector<288x4xf32> to vector<288x4xbf16>
    %c0_7 = arith.constant 0 : index
    %c0_8 = arith.constant 0 : index
    %c0_9 = arith.constant 0 : index
    %9 = vector.load %arg4[%c0_7, %c0_8, %c0_9] : memref<1x288x128xf32, #tpu.memory_space<vmem>>, vector<1x288x128xf32>
    %10 = vector.shape_cast %9 : vector<1x288x128xf32> to vector<288x128xf32>
    %c0_10 = arith.constant 0 : index
    %c0_11 = arith.constant 0 : index
    %c0_12 = arith.constant 0 : index
    %11 = vector.load %arg2[%c0_10, %c0_11, %c0_12] : memref<9x4x128xbf16, #tpu.memory_space<vmem>>, vector<1x4x128xbf16>
    %12 = vector.shape_cast %11 : vector<1x4x128xbf16> to vector<4x128xbf16>
    %cst = arith.constant dense<0.000000e+00> : vector<288x128xf32>
    %13 = tpu.matmul %8, %12, %cst {dimension_numbers = #tpu.dot_dimension_numbers<[1], [0], [0], [1], [0, 0, 1, 1], [], []>} : vector<288x4xbf16>, vector<4x128xbf16>, vector<288x128xf32> -> vector<288x128xf32>
    %14 = arith.addf %10, %13 : vector<288x128xf32>
    %c0_13 = arith.constant 0 : index
    %c0_14 = arith.constant 0 : index
    %c0_15 = arith.constant 0 : index
    %15 = vector.load %arg4[%c0_13, %c0_14, %c0_15] : memref<1x288x128xf32, #tpu.memory_space<vmem>>, vector<1x288x128xf32>
    %16 = vector.shape_cast %15 : vector<1x288x128xf32> to vector<288x128xf32>
    %17 = vector.shape_cast %14 : vector<288x128xf32> to vector<1x288x128xf32>
    tpu.vector_store %arg4[%c0_13, %c0_14, %c0_15], %17 {strides = array<i32>} : memref<1x288x128xf32, #tpu.memory_space<vmem>>, vector<1x288x128xf32>,
    %c0_16 = arith.constant 0 : index
    %c1 = arith.constant 1 : index
    %c0_17 = arith.constant 0 : index
    %18 = vector.load %arg1[%c0_16, %c1, %c0_17] : memref<1x326x4xf32, #tpu.memory_space<vmem>>, vector<1x288x4xf32>
    %19 = vector.shape_cast %18 : vector<1x288x4xf32> to vector<288x4xf32>
    %20 = arith.truncf %19 : vector<288x4xf32> to vector<288x4xbf16>
    %c0_18 = arith.constant 0 : index
    %c0_19 = arith.constant 0 : index
    %c0_20 = arith.constant 0 : index
    %21 = vector.load %arg4[%c0_18, %c0_19, %c0_20] : memref<1x288x128xf32, #tpu.memory_space<vmem>>, vector<1x288x128xf32>
    %22 = vector.shape_cast %21 : vector<1x288x128xf32> to vector<288x128xf32>
    %c1_21 = arith.constant 1 : index
    %c0_22 = arith.constant 0 : index
    %c0_23 = arith.constant 0 : index
    %23 = vector.load %arg2[%c1_21, %c0_22, %c0_23] : memref<9x4x128xbf16, #tpu.memory_space<vmem>>, vector<1x4x128xbf16>
    %24 = vector.shape_cast %23 : vector<1x4x128xbf16> to vector<4x128xbf16>
    %cst_24 = arith.constant dense<0.000000e+00> : vector<288x128xf32>
    %25 = tpu.matmul %20, %24, %cst_24 {dimension_numbers = #tpu.dot_dimension_numbers<[1], [0], [0], [1], [0, 0, 1, 1], [], []>} : vector<288x4xbf16>, vector<4x128xbf16>, vector<288x128xf32> -> vector<288x128xf32>
    %26 = arith.addf %22, %25 : vector<288x128xf32>
    %c0_25 = arith.constant 0 : index
    %c0_26 = arith.constant 0 : index
    %c0_27 = arith.constant 0 : index
    %27 = vector.load %arg4[%c0_25, %c0_26, %c0_27] : memref<1x288x128xf32, #tpu.memory_space<vmem>>, vector<1x288x128xf32>
    %28 = vector.shape_cast %27 : vector<1x288x128xf32> to vector<288x128xf32>
    %29 = vector.shape_cast %26 : vector<288x128xf32> to vector<1x288x128xf32>
    tpu.vector_store %arg4[%c0_25, %c0_26, %c0_27], %29 {strides = array<i32>} : memref<1x288x128xf32, #tpu.memory_space<vmem>>, vector<1x288x128xf32>,
    %c0_28 = arith.constant 0 : index
    %c2 = arith.constant 2 : index
    %c0_29 = arith.constant 0 : index
    %30 = vector.load %arg1[%c0_28, %c2, %c0_29] : memref<1x326x4xf32, #tpu.memory_space<vmem>>, vector<1x288x4xf32>
    %31 = vector.shape_cast %30 : vector<1x288x4xf32> to vector<288x4xf32>
    %32 = arith.truncf %31 : vector<288x4xf32> to vector<288x4xbf16>
    %c0_30 = arith.constant 0 : index
    %c0_31 = arith.constant 0 : index
    %c0_32 = arith.constant 0 : index
    %33 = vector.load %arg4[%c0_30, %c0_31, %c0_32] : memref<1x288x128xf32, #tpu.memory_space<vmem>>, vector<1x288x128xf32>
    %34 = vector.shape_cast %33 : vector<1x288x128xf32> to vector<288x128xf32>
    %c2_33 = arith.constant 2 : index
    %c0_34 = arith.constant 0 : index
    %c0_35 = arith.constant 0 : index
    %35 = vector.load %arg2[%c2_33, %c0_34, %c0_35] : memref<9x4x128xbf16, #tpu.memory_space<vmem>>, vector<1x4x128xbf16>
    %36 = vector.shape_cast %35 : vector<1x4x128xbf16> to vector<4x128xbf16>
    %cst_36 = arith.constant dense<0.000000e+00> : vector<288x128xf32>
    %37 = tpu.matmul %32, %36, %cst_36 {dimension_numbers = #tpu.dot_dimension_numbers<[1], [0], [0], [1], [0, 0, 1, 1], [], []>} : vector<288x4xbf16>, vector<4x128xbf16>, vector<288x128xf32> -> vector<288x128xf32>
    %38 = arith.addf %34, %37 : vector<288x128xf32>
    %c0_37 = arith.constant 0 : index
    %c0_38 = arith.constant 0 : index
    %c0_39 = arith.constant 0 : index
    %39 = vector.load %arg4[%c0_37, %c0_38, %c0_39] : memref<1x288x128xf32, #tpu.memory_space<vmem>>, vector<1x288x128xf32>
    %40 = vector.shape_cast %39 : vector<1x288x128xf32> to vector<288x128xf32>
    %41 = vector.shape_cast %38 : vector<288x128xf32> to vector<1x288x128xf32>
    tpu.vector_store %arg4[%c0_37, %c0_38, %c0_39], %41 {strides = array<i32>} : memref<1x288x128xf32, #tpu.memory_space<vmem>>, vector<1x288x128xf32>,
    %c0_40 = arith.constant 0 : index
    %c18 = arith.constant 18 : index
    %c0_41 = arith.constant 0 : index
    %42 = vector.load %arg1[%c0_40, %c18, %c0_41] : memref<1x326x4xf32, #tpu.memory_space<vmem>>, vector<1x288x4xf32>
    %43 = vector.shape_cast %42 : vector<1x288x4xf32> to vector<288x4xf32>
    %44 = arith.truncf %43 : vector<288x4xf32> to vector<288x4xbf16>
    %c0_42 = arith.constant 0 : index
    %c0_43 = arith.constant 0 : index
    %c0_44 = arith.constant 0 : index
    %45 = vector.load %arg4[%c0_42, %c0_43, %c0_44] : memref<1x288x128xf32, #tpu.memory_space<vmem>>, vector<1x288x128xf32>
    %46 = vector.shape_cast %45 : vector<1x288x128xf32> to vector<288x128xf32>
    %c3 = arith.constant 3 : index
    %c0_45 = arith.constant 0 : index
    %c0_46 = arith.constant 0 : index
    %47 = vector.load %arg2[%c3, %c0_45, %c0_46] : memref<9x4x128xbf16, #tpu.memory_space<vmem>>, vector<1x4x128xbf16>
    %48 = vector.shape_cast %47 : vector<1x4x128xbf16> to vector<4x128xbf16>
    %cst_47 = arith.constant dense<0.000000e+00> : vector<288x128xf32>
    %49 = tpu.matmul %44, %48, %cst_47 {dimension_numbers = #tpu.dot_dimension_numbers<[1], [0], [0], [1], [0, 0, 1, 1], [], []>} : vector<288x4xbf16>, vector<4x128xbf16>, vector<288x128xf32> -> vector<288x128xf32>
    %50 = arith.addf %46, %49 : vector<288x128xf32>
    %c0_48 = arith.constant 0 : index
    %c0_49 = arith.constant 0 : index
    %c0_50 = arith.constant 0 : index
    %51 = vector.load %arg4[%c0_48, %c0_49, %c0_50] : memref<1x288x128xf32, #tpu.memory_space<vmem>>, vector<1x288x128xf32>
    %52 = vector.shape_cast %51 : vector<1x288x128xf32> to vector<288x128xf32>
    %53 = vector.shape_cast %50 : vector<288x128xf32> to vector<1x288x128xf32>
    tpu.vector_store %arg4[%c0_48, %c0_49, %c0_50], %53 {strides = array<i32>} : memref<1x288x128xf32, #tpu.memory_space<vmem>>, vector<1x288x128xf32>,
    %c0_51 = arith.constant 0 : index
    %c19 = arith.constant 19 : index
    %c0_52 = arith.constant 0 : index
    %54 = vector.load %arg1[%c0_51, %c19, %c0_52] : memref<1x326x4xf32, #tpu.memory_space<vmem>>, vector<1x288x4xf32>
    %55 = vector.shape_cast %54 : vector<1x288x4xf32> to vector<288x4xf32>
    %56 = arith.truncf %55 : vector<288x4xf32> to vector<288x4xbf16>
    %c0_53 = arith.constant 0 : index
    %c0_54 = arith.constant 0 : index
    %c0_55 = arith.constant 0 : index
    %57 = vector.load %arg4[%c0_53, %c0_54, %c0_55] : memref<1x288x128xf32, #tpu.memory_space<vmem>>, vector<1x288x128xf32>
    %58 = vector.shape_cast %57 : vector<1x288x128xf32> to vector<288x128xf32>
    %c4 = arith.constant 4 : index
    %c0_56 = arith.constant 0 : index
    %c0_57 = arith.constant 0 : index
    %59 = vector.load %arg2[%c4, %c0_56, %c0_57] : memref<9x4x128xbf16, #tpu.memory_space<vmem>>, vector<1x4x128xbf16>
    %60 = vector.shape_cast %59 : vector<1x4x128xbf16> to vector<4x128xbf16>
    %cst_58 = arith.constant dense<0.000000e+00> : vector<288x128xf32>
    %61 = tpu.matmul %56, %60, %cst_58 {dimension_numbers = #tpu.dot_dimension_numbers<[1], [0], [0], [1], [0, 0, 1, 1], [], []>} : vector<288x4xbf16>, vector<4x128xbf16>, vector<288x128xf32> -> vector<288x128xf32>
    %62 = arith.addf %58, %61 : vector<288x128xf32>
    %c0_59 = arith.constant 0 : index
    %c0_60 = arith.constant 0 : index
    %c0_61 = arith.constant 0 : index
    %63 = vector.load %arg4[%c0_59, %c0_60, %c0_61] : memref<1x288x128xf32, #tpu.memory_space<vmem>>, vector<1x288x128xf32>
    %64 = vector.shape_cast %63 : vector<1x288x128xf32> to vector<288x128xf32>
    %65 = vector.shape_cast %62 : vector<288x128xf32> to vector<1x288x128xf32>
    tpu.vector_store %arg4[%c0_59, %c0_60, %c0_61], %65 {strides = array<i32>} : memref<1x288x128xf32, #tpu.memory_space<vmem>>, vector<1x288x128xf32>,
    %c0_62 = arith.constant 0 : index
    %c20 = arith.constant 20 : index
    %c0_63 = arith.constant 0 : index
    %66 = vector.load %arg1[%c0_62, %c20, %c0_63] : memref<1x326x4xf32, #tpu.memory_space<vmem>>, vector<1x288x4xf32>
    %67 = vector.shape_cast %66 : vector<1x288x4xf32> to vector<288x4xf32>
    %68 = arith.truncf %67 : vector<288x4xf32> to vector<288x4xbf16>
    %c0_64 = arith.constant 0 : index
    %c0_65 = arith.constant 0 : index
    %c0_66 = arith.constant 0 : index
    %69 = vector.load %arg4[%c0_64, %c0_65, %c0_66] : memref<1x288x128xf32, #tpu.memory_space<vmem>>, vector<1x288x128xf32>
    %70 = vector.shape_cast %69 : vector<1x288x128xf32> to vector<288x128xf32>
    %c5 = arith.constant 5 : index
    %c0_67 = arith.constant 0 : index
    %c0_68 = arith.constant 0 : index
    %71 = vector.load %arg2[%c5, %c0_67, %c0_68] : memref<9x4x128xbf16, #tpu.memory_space<vmem>>, vector<1x4x128xbf16>
    %72 = vector.shape_cast %71 : vector<1x4x128xbf16> to vector<4x128xbf16>
    %cst_69 = arith.constant dense<0.000000e+00> : vector<288x128xf32>
    %73 = tpu.matmul %68, %72, %cst_69 {dimension_numbers = #tpu.dot_dimension_numbers<[1], [0], [0], [1], [0, 0, 1, 1], [], []>} : vector<288x4xbf16>, vector<4x128xbf16>, vector<288x128xf32> -> vector<288x128xf32>
    %74 = arith.addf %70, %73 : vector<288x128xf32>
    %c0_70 = arith.constant 0 : index
    %c0_71 = arith.constant 0 : index
    %c0_72 = arith.constant 0 : index
    %75 = vector.load %arg4[%c0_70, %c0_71, %c0_72] : memref<1x288x128xf32, #tpu.memory_space<vmem>>, vector<1x288x128xf32>
    %76 = vector.shape_cast %75 : vector<1x288x128xf32> to vector<288x128xf32>
    %77 = vector.shape_cast %74 : vector<288x128xf32> to vector<1x288x128xf32>
    tpu.vector_store %arg4[%c0_70, %c0_71, %c0_72], %77 {strides = array<i32>} : memref<1x288x128xf32, #tpu.memory_space<vmem>>, vector<1x288x128xf32>,
    %c0_73 = arith.constant 0 : index
    %c36 = arith.constant 36 : index
    %c0_74 = arith.constant 0 : index
    %78 = vector.load %arg1[%c0_73, %c36, %c0_74] : memref<1x326x4xf32, #tpu.memory_space<vmem>>, vector<1x288x4xf32>
    %79 = vector.shape_cast %78 : vector<1x288x4xf32> to vector<288x4xf32>
    %80 = arith.truncf %79 : vector<288x4xf32> to vector<288x4xbf16>
    %c0_75 = arith.constant 0 : index
    %c0_76 = arith.constant 0 : index
    %c0_77 = arith.constant 0 : index
    %81 = vector.load %arg4[%c0_75, %c0_76, %c0_77] : memref<1x288x128xf32, #tpu.memory_space<vmem>>, vector<1x288x128xf32>
    %82 = vector.shape_cast %81 : vector<1x288x128xf32> to vector<288x128xf32>
    %c6 = arith.constant 6 : index
    %c0_78 = arith.constant 0 : index
    %c0_79 = arith.constant 0 : index
    %83 = vector.load %arg2[%c6, %c0_78, %c0_79] : memref<9x4x128xbf16, #tpu.memory_space<vmem>>, vector<1x4x128xbf16>
    %84 = vector.shape_cast %83 : vector<1x4x128xbf16> to vector<4x128xbf16>
    %cst_80 = arith.constant dense<0.000000e+00> : vector<288x128xf32>
    %85 = tpu.matmul %80, %84, %cst_80 {dimension_numbers = #tpu.dot_dimension_numbers<[1], [0], [0], [1], [0, 0, 1, 1], [], []>} : vector<288x4xbf16>, vector<4x128xbf16>, vector<288x128xf32> -> vector<288x128xf32>
    %86 = arith.addf %82, %85 : vector<288x128xf32>
    %c0_81 = arith.constant 0 : index
    %c0_82 = arith.constant 0 : index
    %c0_83 = arith.constant 0 : index
    %87 = vector.load %arg4[%c0_81, %c0_82, %c0_83] : memref<1x288x128xf32, #tpu.memory_space<vmem>>, vector<1x288x128xf32>
    %88 = vector.shape_cast %87 : vector<1x288x128xf32> to vector<288x128xf32>
    %89 = vector.shape_cast %86 : vector<288x128xf32> to vector<1x288x128xf32>
    tpu.vector_store %arg4[%c0_81, %c0_82, %c0_83], %89 {strides = array<i32>} : memref<1x288x128xf32, #tpu.memory_space<vmem>>, vector<1x288x128xf32>,
    %c0_84 = arith.constant 0 : index
    %c37 = arith.constant 37 : index
    %c0_85 = arith.constant 0 : index
    %90 = vector.load %arg1[%c0_84, %c37, %c0_85] : memref<1x326x4xf32, #tpu.memory_space<vmem>>, vector<1x288x4xf32>
    %91 = vector.shape_cast %90 : vector<1x288x4xf32> to vector<288x4xf32>
    %92 = arith.truncf %91 : vector<288x4xf32> to vector<288x4xbf16>
    %c0_86 = arith.constant 0 : index
    %c0_87 = arith.constant 0 : index
    %c0_88 = arith.constant 0 : index
    %93 = vector.load %arg4[%c0_86, %c0_87, %c0_88] : memref<1x288x128xf32, #tpu.memory_space<vmem>>, vector<1x288x128xf32>
    %94 = vector.shape_cast %93 : vector<1x288x128xf32> to vector<288x128xf32>
    %c7 = arith.constant 7 : index
    %c0_89 = arith.constant 0 : index
    %c0_90 = arith.constant 0 : index
    %95 = vector.load %arg2[%c7, %c0_89, %c0_90] : memref<9x4x128xbf16, #tpu.memory_space<vmem>>, vector<1x4x128xbf16>
    %96 = vector.shape_cast %95 : vector<1x4x128xbf16> to vector<4x128xbf16>
    %cst_91 = arith.constant dense<0.000000e+00> : vector<288x128xf32>
    %97 = tpu.matmul %92, %96, %cst_91 {dimension_numbers = #tpu.dot_dimension_numbers<[1], [0], [0], [1], [0, 0, 1, 1], [], []>} : vector<288x4xbf16>, vector<4x128xbf16>, vector<288x128xf32> -> vector<288x128xf32>
    %98 = arith.addf %94, %97 : vector<288x128xf32>
    %c0_92 = arith.constant 0 : index
    %c0_93 = arith.constant 0 : index
    %c0_94 = arith.constant 0 : index
    %99 = vector.load %arg4[%c0_92, %c0_93, %c0_94] : memref<1x288x128xf32, #tpu.memory_space<vmem>>, vector<1x288x128xf32>
    %100 = vector.shape_cast %99 : vector<1x288x128xf32> to vector<288x128xf32>
    %101 = vector.shape_cast %98 : vector<288x128xf32> to vector<1x288x128xf32>
    tpu.vector_store %arg4[%c0_92, %c0_93, %c0_94], %101 {strides = array<i32>} : memref<1x288x128xf32, #tpu.memory_space<vmem>>, vector<1x288x128xf32>,
    %c0_95 = arith.constant 0 : index
    %c38 = arith.constant 38 : index
    %c0_96 = arith.constant 0 : index
    %102 = vector.load %arg1[%c0_95, %c38, %c0_96] : memref<1x326x4xf32, #tpu.memory_space<vmem>>, vector<1x288x4xf32>
    %103 = vector.shape_cast %102 : vector<1x288x4xf32> to vector<288x4xf32>
    %104 = arith.truncf %103 : vector<288x4xf32> to vector<288x4xbf16>
    %c0_97 = arith.constant 0 : index
    %c0_98 = arith.constant 0 : index
    %c0_99 = arith.constant 0 : index
    %105 = vector.load %arg4[%c0_97, %c0_98, %c0_99] : memref<1x288x128xf32, #tpu.memory_space<vmem>>, vector<1x288x128xf32>
    %106 = vector.shape_cast %105 : vector<1x288x128xf32> to vector<288x128xf32>
    %c8 = arith.constant 8 : index
    %c0_100 = arith.constant 0 : index
    %c0_101 = arith.constant 0 : index
    %107 = vector.load %arg2[%c8, %c0_100, %c0_101] : memref<9x4x128xbf16, #tpu.memory_space<vmem>>, vector<1x4x128xbf16>
    %108 = vector.shape_cast %107 : vector<1x4x128xbf16> to vector<4x128xbf16>
    %cst_102 = arith.constant dense<0.000000e+00> : vector<288x128xf32>
    %109 = tpu.matmul %104, %108, %cst_102 {dimension_numbers = #tpu.dot_dimension_numbers<[1], [0], [0], [1], [0, 0, 1, 1], [], []>} : vector<288x4xbf16>, vector<4x128xbf16>, vector<288x128xf32> -> vector<288x128xf32>
    %110 = arith.addf %106, %109 : vector<288x128xf32>
    %c0_103 = arith.constant 0 : index
    %c0_104 = arith.constant 0 : index
    %c0_105 = arith.constant 0 : index
    %111 = vector.load %arg4[%c0_103, %c0_104, %c0_105] : memref<1x288x128xf32, #tpu.memory_space<vmem>>, vector<1x288x128xf32>
    %112 = vector.shape_cast %111 : vector<1x288x128xf32> to vector<288x128xf32>
    %113 = vector.shape_cast %110 : vector<288x128xf32> to vector<1x288x128xf32>
    tpu.vector_store %arg4[%c0_103, %c0_104, %c0_105], %113 {strides = array<i32>} : memref<1x288x128xf32, #tpu.memory_space<vmem>>, vector<1x288x128xf32>,
    return
  }
  func.func @transform_0(%arg0: i32) -> (i32, i32, i32) {
    %c0_i32 = arith.constant 0 : i32
    %c0_i32_0 = arith.constant 0 : i32
    %c0_i32_1 = arith.constant 0 : i32
    return %arg0, %c0_i32, %c0_i32_0 : i32, i32, i32
  }
  func.func @transform_1(%arg0: i32) -> (i32, i32, i32) {
    %c0_i32 = arith.constant 0 : i32
    %c0_i32_0 = arith.constant 0 : i32
    %c0_i32_1 = arith.constant 0 : i32
    %c0_i32_2 = arith.constant 0 : i32
    return %c0_i32, %c0_i32_0, %c0_i32_1 : i32, i32, i32
  }
  func.func @transform_2(%arg0: i32) -> (i32, i32) {
    %c0_i32 = arith.constant 0 : i32
    %c0_i32_0 = arith.constant 0 : i32
    %c0_i32_1 = arith.constant 0 : i32
    return %c0_i32, %c0_i32_0 : i32, i32
  }
  func.func @transform_3(%arg0: i32) -> (i32, i32, i32) {
    %c0_i32 = arith.constant 0 : i32
    %c0_i32_0 = arith.constant 0 : i32
    %c0_i32_1 = arith.constant 0 : i32
    return %arg0, %c0_i32, %c0_i32_0 : i32, i32, i32
  }
}

</mosaic_0001>

<bundles_post_ra>
// kernel: tpu_custom_call.1
= control target key start
LH: loop header
LB: loop body
LE: loop exit
PB: predicated region body
PF: predicated region fallthrough
CT: control target
= control target key end

     0   :  { %8 = vsyncpa [#allocation3], 0  ;;  %s5881_s0 = inlined_call_operand.vmem [shape: f32[2,326,4], index: 0, kind: input, shape index: {}]   ;;  %s5882_s1 = inlined_call_operand.vmem [shape: bf16[9,4,128], index: 1, kind: input, shape index: {}]   ;;  %s5883_s2 = inlined_call_operand.vmem [shape: f32[1,128], index: 2, kind: input, shape index: {}]   ;;  %s5884_s3 = inlined_call_operand.hbm [shape: f32[2,288,128], index: 3, kind: output, shape index: {}]  }
   0x1   :  { %10 = vsyncpa [#allocation3 + $0x1], 0  ;;  %s4705_s12 = smov 0   ;;  %s4707_s13 = smov 0  }
   0x2   :  { %s4709_s14 = smov 0   ;;  %s4711_s15 = smov 0  }
   0x3 LB: > { %s4726_s16 = sadd.s32 4294967295, %s4680_s15   ;;  %s3872_s17 = sadd.s32 4294967294, %s4680_s15   ;;  %s4680_s15 = sphi %s4711_s15, %s5890_s15   ;;  %s4676_s14 = sphi %s4709_s14, %s5889_s14   ;;  %s4672_s13 = sphi %s4707_s13, %s5888_s13   ;;  %s4668_s12 = sphi %s4705_s12, %s5887_s12  }
   0x4   : > { %s4730_s18 = sadd.s32 1, %s4680_s15   ;;  %s91_s19 = sadd.s32 1, %s4676_s14 }
   0x5   : > { %s88_s20 = ssub.s32 %s4680_s15, %s4730_s18  ;;  %p101_p0 = scmp.ne.s32.totalorder %s4676_s14, %s4672_s13 }
   0x6   : > { %p89_p1 = scmp.eq.s32.totalorder %s88_s20, 0  ;;  %p102_p2 = scmp.eq.s32.totalorder %s4726_s16, 1 }
   0x7   : > { %p107_p3 = scmp.ne.s32.totalorder %s4672_s13, %s4668_s12  ;;  %p108_p4 = scmp.eq.s32.totalorder %s3872_s17, 1 }
   0x8   : > { %s4741_s21 = scalar_select %p89_p1, %s4676_s14, %s91_s19  }
   0x9   : > { %p4743_p5 = por %p102_p2, %p101_p0  ;;  %p4747_p6 = por %p108_p4, %p107_p3 }
   0xa   : > { %p3875_p7 = scmp.ge.s32.totalorder %s4680_s15, 1  ;;  %p140_p8 = scmp.lt.s32.totalorder %s4680_s15, 3 }
   0xc   : > { %p141_p9 = pnand %p3875_p7, %p140_p8 }
   0xd   : > { %p164_p10 = scmp.lt.s32.totalorder (!%p141_p9), %s4726_s16, 1  ;;  %s4682_s19 = smov (!%p141_p9), [#allocation2]  }
   0xe   : > { %144 = sbr.rel (%p141_p9) target bundleno = 563 (0x233), region = 32  ;;  %s4624_s20 = sshll.u32 (!%p141_p9), %s4682_s19, 4  ;;  %s4625_s20 = int_to_ptr.vmem [resolvable:$false] %s4624_s20 }
   0xf   : > { %s4626_s24 = scalar_lea.vmem (!%p141_p9), %s4625_s20, 9216 }
  0x13   : > { %v303_v0 = vld [vmem:[%s5882_s1] sm:$0x3]  ;;  %vm359_vm0 = vcmask 1041408   ;;  %v3896_v2 = vld [vmem:[%s5882_s1 + $0x2] sm:$0x3]  ;;  %s165_s30 = scalar_select %p164_p10, %s4726_s16, 1 }
  0x14   : > { %4567 = vmatprep.subr.msk.bf16.mxu1 %vm359_vm0, %v303_v0  ;;  %4566 = vmatprep.subr.msk.bf16.mxu0 %vm359_vm0, %v303_v0  ;;  %v361_v1 = vsel %vm359_vm0, %v303_v0, 0  ;;  %v3915_v3 = vld [vmem:[%s5882_s1 + $0x4] sm:$0x3]  ;;  %vm304_vm1 = vcmask 31744   ;;  %v759_v18 = vsel %vm359_vm0, %v3896_v2, 0 }
  0x15   : > { %4565 = vmatpush3.bf16.msra.mxu1 %v361_v1  ;;  %4223 = vmatpush3.bf16.msra.mxu0 %v361_v1  ;;  %s4577_s4 = smul.u32 328, %s165_s30  ;;  %v1157_v15 = vsel %vm359_vm0, %v3915_v3, 0  ;;  %v4794_v24 = vld [vmem:[%s5882_s1 + $0x6] sm:$0x3]  ;;  %v4799_v25 = vld [vmem:[%s5882_s1 + $0x8] sm:$0x3] }
  0x16   : > { %4568 = vmatprep.subr.msk.bf16.mxu1 %vm359_vm0, %v3896_v2  ;;  %4569 = vmatprep.subr.msk.bf16.mxu0 %vm359_vm0, %v3915_v3 }
  0x17   : > { %s4772_s7 = scalar_lea.vmem %s5881_s0, %s4577_s4  ;;  %s161_s4 = sand.u32 1, %s4672_s13  }
  0x18   : > { %v213_v4 = vld [vmem:[%s4772_s7] sm:$0xff]  ;;  %v214_v5 = vld [vmem:[%s4772_s7 + $0x8] sm:$0xff]  ;;  %v215_v9 = vld [vmem:[%s4772_s7 + $0x10] sm:$0xff]  ;;  %s4576_s5 = smul.u32 288, %s161_s4 }
  0x19   : > { %v233_v6 = vld [vmem:[%s4772_s7 + $0xa0] sm:$0xff]  ;;  %v249_v7 = vpack.c.bf16 %v214_v5, %v213_v4  ;;  %v234_v8 = vld [vmem:[%s4772_s7 + $0xa8] sm:$0xff]  ;;  %v216_v10 = vld [vmem:[%s4772_s7 + $0x18] sm:$0xff] }
  0x1a   : > { %v259_v11 = vpack.c.bf16 %v234_v8, %v233_v6  ;;  %v250_v12 = vpack.c.bf16 %v216_v10, %v215_v9  ;;  %v235_v13 = vld [vmem:[%s4772_s7 + $0xb0] sm:$0xff]  ;;  %v236_v14 = vld [vmem:[%s4772_s7 + $0xb8] sm:$0xff]  ;;  %v217_v16 = vld [vmem:[%s4772_s7 + $0x20] sm:$0xff]  ;;  %v1555_v10 = vsel %vm359_vm0, %v4794_v24, 0  ;;  %s5759_s6 = scalar_lea.vmem [#allocation2], %s4576_s5 }
  0x1b   : > { %4224 = vmatprep.mubr.msk.bf16.mxu0 %vm304_vm1, %v249_v7  ;;  %v260_v17 = vpack.c.bf16 %v236_v14, %v235_v13  ;;  %v218_v19 = vld [vmem:[%s4772_s7 + $0x28] sm:$0xff]  ;;  %v237_v20 = vld [vmem:[%s4772_s7 + $0xc0] sm:$0xff]  ;;  %v219_v26 = vld [vmem:[%s4772_s7 + $0x30] sm:$0xff]  ;;  %s3810_s8 = sshll.u32 %s5759_s6, 4  ;;  %s5835_s8 = int_to_ptr.vmem [resolvable:$true] %s3810_s8 }
  0x1c   : > { %v238_v21 = vld [vmem:[%s4772_s7 + $0xc8] sm:$0xff]  ;;  %4244 = vmatprep.mubr.msk.bf16.mxu1 %vm304_vm1, %v259_v11  ;;  %4225 = vmatmul.mubr.msk.bf16.vlgmr.msra.gmra.mxu0 %vm304_vm1, %v250_v12  ;;  %v251_v22 = vpack.c.bf16 %v218_v19, %v217_v16  ;;  %v220_v27 = vld [vmem:[%s4772_s7 + $0x38] sm:$0xff]  ;;  %v239_v28 = vld [vmem:[%s4772_s7 + $0xd0] sm:$0xff]  ;;  %s4620_s17 = scalar_lea.vmem %s5835_s8, 4608  ;;  %p4627_p0 = scmp.lt.s32.totalorder %s5835_s8, %s4625_s20 }
  0x1d   : > { %v261_v23 = vpack.c.bf16 %v238_v21, %v237_v20  ;;  %4245 = vmatmul.mubr.msk.bf16.vlgmr.msra.gmra.mxu1 %vm304_vm1, %v260_v17  ;;  %4299 = vmatpush3.bf16.msra.mxu0 %v1157_v15  ;;  %v240_v29 = vld [vmem:[%s4772_s7 + $0xd8] sm:$0xff]  ;;  %v221_v30 = vld [vmem:[%s4772_s7 + $0x40] sm:$0xff]  ;;  %v222_v31 = vld [vmem:[%s4772_s7 + $0x48] sm:$0xff]  ;;  %v252_v34 = vpack.c.bf16 %v220_v27, %v219_v26  ;;  %p4621_p11 = scmp.ne.s32.totalorder %s5835_s8, %s4620_s17  ;;  %p4628_p1 = scmp.lt.s32.totalorder %s4626_s24, %s4620_s17 }
  0x1e   : > { %4261 = vmatpush3.bf16.msra.mxu1 %v759_v18  ;;  %4228 = vmatprep.mubr.msk.bf16.mxu0 %vm304_vm1, %v251_v22  ;;  %v241_v32 = vld [vmem:[%s4772_s7 + $0xe0] sm:$0xff]  ;;  %v242_v33 = vld [vmem:[%s4772_s7 + $0xe8] sm:$0xff]  ;;  %v262_v35 = vpack.c.bf16 %v240_v29, %v239_v28  ;;  %v253_v36 = vpack.c.bf16 %v222_v31, %v221_v30  ;;  %v223_v38 = vld [vmem:[%s4772_s7 + $0x50] sm:$0xff]  ;;  %v1953_v22 = vsel %vm359_vm0, %v4799_v25, 0 }
  0x1f   : > { %4248 = vmatprep.mubr.msk.bf16.mxu1 %vm304_vm1, %v261_v23  ;;  %4570 = vmatprep.subr.msk.bf16.mxu1 %vm359_vm0, %v4794_v24  ;;  %v263_v37 = vpack.c.bf16 %v242_v33, %v241_v32  ;;  %v224_v39 = vld [vmem:[%s4772_s7 + $0x58] sm:$0xff]  ;;  %v243_v40 = vld [vmem:[%s4772_s7 + $0xf0] sm:$0xff]  ;;  %v225_v42 = vld [vmem:[%s4772_s7 + $0x60] sm:$0xff]  ;;  %p4622_p12 = pnand %p4621_p11, %p4743_p5  ;;  %p4629_p2 = por %p4628_p1, %p4627_p0 }
  0x20   : > { %4571 = vmatprep.subr.msk.bf16.mxu0 %vm359_vm0, %v4799_v25  ;;  %v244_v41 = vld [vmem:[%s4772_s7 + $0xf8] sm:$0xff]  ;;  %v226_v43 = vld [vmem:[%s4772_s7 + $0x68] sm:$0xff]  ;;  %v245_v44 = vld [vmem:[%s4772_s7 + $0x100] sm:$0xff]  ;;  %v254_v46 = vpack.c.bf16 %v224_v39, %v223_v38 }
  0x21   : > { %v246_v45 = vld [vmem:[%s4772_s7 + $0x108] sm:$0xff]  ;;  %v264_v47 = vpack.c.bf16 %v244_v41, %v243_v40  ;;  %v255_v48 = vpack.c.bf16 %v226_v43, %v225_v42  ;;  %v227_v50 = vld [vmem:[%s4772_s7 + $0x70] sm:$0xff]  ;;  %v228_v51 = vld [vmem:[%s4772_s7 + $0x78] sm:$0xff]  ;;  %p4623_p13 = pneg %p4622_p12 }
  0x22   : > { %v265_v49 = vpack.c.bf16 %v246_v45, %v245_v44  ;;  %v247_v52 = vld [vmem:[%s4772_s7 + $0x110] sm:$0xff]  ;;  %v248_v53 = vld [vmem:[%s4772_s7 + $0x118] sm:$0xff]  ;;  %v229_v54 = vld [vmem:[%s4772_s7 + $0x80] sm:$0xff]  ;;  %v256_v58 = vpack.c.bf16 %v228_v51, %v227_v50 }
  0x23   : > { %v230_v55 = vld [vmem:[%s4772_s7 + $0x88] sm:$0xff]  ;;  %v266_v59 = vpack.c.bf16 %v248_v53, %v247_v52  ;;  %v231_v62 = vld [vmem:[%s4772_s7 + $0x90] sm:$0xff]  ;;  %v232_v63 = vld [vmem:[%s4772_s7 + $0x98] sm:$0xff]  ;;  %p4630_p3 = pnand %p4629_p2, %p4623_p13 }
  0x24   : > { %4229 = vmatmul.mubr.msk.bf16.gmra.mxu0 %vm304_vm1, %v252_v34  ;;  %v612_v56 = vld [vmem:[%s4772_s7 + $0x1] sm:$0xff]  ;;  %v613_v57 = vld [vmem:[%s4772_s7 + $0x9] sm:$0xff]  ;;  %v257_v60 = vpack.c.bf16 %v230_v55, %v229_v54  ;;  %v614_v0 = vld [vmem:[%s4772_s7 + $0x11] sm:$0xff]  ;;  %v258_v6 = vpack.c.bf16 %v232_v63, %v231_v62 }
  0x25   : > { %4249 = vmatmul.mubr.msk.bf16.gmra.mxu1 %vm304_vm1, %v262_v35  ;;  %4232 = vmatprep.mubr.msk.bf16.mxu0 %vm304_vm1, %v253_v36  ;;  %v648_v61 = vpack.c.bf16 %v613_v57, %v612_v56  ;;  %v615_v1 = vld [vmem:[%s4772_s7 + $0x19] sm:$0xff]  ;;  %v1010_v2 = vld [vmem:[%s4772_s7 + $0x2] sm:$0xff]  ;;  %v1011_v3 = vld [vmem:[%s4772_s7 + $0xa] sm:$0xff] }
  0x26   : > { %4252 = vmatprep.mubr.msk.bf16.mxu1 %vm304_vm1, %v263_v37  ;;  %v616_v4 = vld [vmem:[%s4772_s7 + $0x21] sm:$0xff]  ;;  %v617_v5 = vld [vmem:[%s4772_s7 + $0x29] sm:$0xff]  ;;  %v649_v7 = vpack.c.bf16 %v615_v1, %v614_v0  ;;  %v1046_v8 = vpack.c.bf16 %v1011_v3, %v1010_v2  ;;  %v1012_v12 = vld [vmem:[%s4772_s7 + $0x12] sm:$0xff] }
  0x27   : > { %v650_v9 = vpack.c.bf16 %v617_v5, %v616_v4  ;;  %v4858_v11 = vld [vmem:[%s5882_s1 + $0xa] sm:$0x3]  ;;  %v1013_v13 = vld [vmem:[%s4772_s7 + $0x1a] sm:$0xff]  ;;  %v618_v14 = vld [vmem:[%s4772_s7 + $0x31] sm:$0xff] }
  0x28   : > { %v619_v15 = vld [vmem:[%s4772_s7 + $0x39] sm:$0xff]  ;;  %v620_v16 = vld [vmem:[%s4772_s7 + $0x41] sm:$0xff]  ;;  %v621_v17 = vld [vmem:[%s4772_s7 + $0x49] sm:$0xff]  ;;  %v4873_v20 = vpack.c.bf16 %v1013_v13, %v1012_v12 }
  0x29   : > { %v1014_v18 = vld [vmem:[%s4772_s7 + $0x22] sm:$0xff]  ;;  %v1015_v19 = vld [vmem:[%s4772_s7 + $0x2a] sm:$0xff]  ;;  %v651_v21 = vpack.c.bf16 %v619_v15, %v618_v14  ;;  %v652_v23 = vpack.c.bf16 %v621_v17, %v620_v16  ;;  %v1016_v28 = vld [vmem:[%s4772_s7 + $0x32] sm:$0xff] }
  0x2a   : > { %v4877_v24 = vpack.c.bf16 %v1015_v19, %v1014_v18  ;;  %v4884_v26 = vld [vmem:[%s5882_s1 + $0xc] sm:$0x3]  ;;  %v622_v27 = vld [vmem:[%s4772_s7 + $0x51] sm:$0xff]  ;;  %v1017_v29 = vld [vmem:[%s4772_s7 + $0x3a] sm:$0xff] }
  0x2b   : > { %v623_v25 = vld [vmem:[%s4772_s7 + $0x59] sm:$0xff]  ;;  %v1018_v30 = vld [vmem:[%s4772_s7 + $0x42] sm:$0xff]  ;;  %v1019_v31 = vld [vmem:[%s4772_s7 + $0x4a] sm:$0xff]  ;;  %v4900_v34 = vpack.c.bf16 %v1017_v29, %v1016_v28 }
  0x2c   : > { %4233 = vmatmul.mubr.msk.bf16.gmra.mxu0 %vm304_vm1, %v254_v46  ;;  %v624_v32 = vld [vmem:[%s4772_s7 + $0x61] sm:$0xff]  ;;  %v625_v33 = vld [vmem:[%s4772_s7 + $0x69] sm:$0xff]  ;;  %v653_v35 = vpack.c.bf16 %v623_v25, %v622_v27  ;;  %v4902_v36 = vpack.c.bf16 %v1019_v31, %v1018_v30  ;;  %v626_v38 = vld [vmem:[%s4772_s7 + $0x71] sm:$0xff] }
  0x2d   : > { %4253 = vmatmul.mubr.msk.bf16.gmra.mxu1 %vm304_vm1, %v264_v47  ;;  %4236 = vmatprep.mubr.msk.bf16.mxu0 %vm304_vm1, %v255_v48  ;;  %v654_v37 = vpack.c.bf16 %v625_v33, %v624_v32  ;;  %v1020_v39 = vld [vmem:[%s4772_s7 + $0x52] sm:$0xff]  ;;  %v1021_v40 = vld [vmem:[%s4772_s7 + $0x5a] sm:$0xff]  ;;  %v1022_v42 = vld [vmem:[%s4772_s7 + $0x62] sm:$0xff] }
  0x2e   : > { %4256 = vmatprep.mubr.msk.bf16.mxu1 %vm304_vm1, %v265_v49  ;;  %v627_v41 = vld [vmem:[%s4772_s7 + $0x79] sm:$0xff]  ;;  %v1023_v43 = vld [vmem:[%s4772_s7 + $0x6a] sm:$0xff]  ;;  %v628_v44 = vld [vmem:[%s4772_s7 + $0x81] sm:$0xff]  ;;  %v4918_v46 = vpack.c.bf16 %v1021_v40, %v1020_v39 }
  0x2f   : > { %v629_v45 = vld [vmem:[%s4772_s7 + $0x89] sm:$0xff]  ;;  %v655_v47 = vpack.c.bf16 %v627_v41, %v626_v38  ;;  %v4920_v48 = vpack.c.bf16 %v1023_v43, %v1022_v42  ;;  %v630_v50 = vld [vmem:[%s4772_s7 + $0x91] sm:$0xff]  ;;  %v1025_v52 = vld [vmem:[%s4772_s7 + $0x7a] sm:$0xff] }
  0x30   : > { %v656_v49 = vpack.c.bf16 %v629_v45, %v628_v44  ;;  %v1024_v51 = vld [vmem:[%s4772_s7 + $0x72] sm:$0xff]  ;;  %v1026_v54 = vld [vmem:[%s4772_s7 + $0x82] sm:$0xff]  ;;  %v1027_v55 = vld [vmem:[%s4772_s7 + $0x8a] sm:$0xff] }
  0x31   : > { %v631_v53 = vld [vmem:[%s4772_s7 + $0x99] sm:$0xff]  ;;  %v632_v56 = vld [vmem:[%s4772_s7 + $0xa1] sm:$0xff]  ;;  %v633_v57 = vld [vmem:[%s4772_s7 + $0xa9] sm:$0xff] }
  0x32   : > { %v634_v62 = vld [vmem:[%s4772_s7 + $0xb1] sm:$0xff]  ;;  %v1029_v0 = vld [vmem:[%s4772_s7 + $0x9a] sm:$0xff]  ;;  %v1030_v2 = vld [vmem:[%s4772_s7 + $0xa2] sm:$0xff] }
  0x33   : > { %v1028_v63 = vld [vmem:[%s4772_s7 + $0x92] sm:$0xff]  ;;  %v1031_v3 = vld [vmem:[%s4772_s7 + $0xaa] sm:$0xff]  ;;  %v636_v4 = vld [vmem:[%s4772_s7 + $0xc1] sm:$0xff] }
  0x34   : > { %4237 = vmatmul.mubr.msk.bf16.gmra.mxu0 %vm304_vm1, %v256_v58  ;;  %v4936_v58 = vpack.c.bf16 %v1025_v52, %v1024_v51  ;;  %v635_v1 = vld [vmem:[%s4772_s7 + $0xb9] sm:$0xff]  ;;  %v637_v5 = vld [vmem:[%s4772_s7 + $0xc9] sm:$0xff]  ;;  %v640_v17 = vld [vmem:[%s4772_s7 + $0xe1] sm:$0xff] }
  0x35   : > { %4257 = vmatmul.mubr.msk.bf16.gmra.mxu1 %vm304_vm1, %v266_v59  ;;  %4240 = vmatprep.mubr.msk.bf16.mxu0 %vm304_vm1, %v257_v60  ;;  %v657_v59 = vpack.c.bf16 %v631_v53, %v630_v50  ;;  %v4938_v60 = vpack.c.bf16 %v1027_v55, %v1026_v54  ;;  %v1032_v12 = vld [vmem:[%s4772_s7 + $0xb2] sm:$0xff]  ;;  %v1033_v13 = vld [vmem:[%s4772_s7 + $0xba] sm:$0xff]  ;;  %v1034_v15 = vld [vmem:[%s4772_s7 + $0xc2] sm:$0xff] }
  0x36   : > { %4262 = vmatprep.mubr.msk.bf16.mxu1 %vm304_vm1, %v648_v61  ;;  %v658_v61 = vpack.c.bf16 %v633_v57, %v632_v56  ;;  %v639_v14 = vld [vmem:[%s4772_s7 + $0xd9] sm:$0xff]  ;;  %v1035_v16 = vld [vmem:[%s4772_s7 + $0xca] sm:$0xff]  ;;  %v4972_v19 = vpack.c.bf16 %v1033_v13, %v1032_v12  ;;  %v1038_v30 = vld [vmem:[%s4772_s7 + $0xe2] sm:$0xff]  ;;  %v2351_v57 = vsel %vm359_vm0, %v4858_v11, 0 }
  0x37   : > { %v641_v18 = vld [vmem:[%s4772_s7 + $0xe9] sm:$0xff]  ;;  %v642_v27 = vld [vmem:[%s4772_s7 + $0xf1] sm:$0xff]  ;;  %v1037_v29 = vld [vmem:[%s4772_s7 + $0xda] sm:$0xff] }
  0x38   : > { %v1036_v28 = vld [vmem:[%s4772_s7 + $0xd2] sm:$0xff]  ;;  %v1039_v31 = vld [vmem:[%s4772_s7 + $0xea] sm:$0xff]  ;;  %v644_v32 = vld [vmem:[%s4772_s7 + $0x101] sm:$0xff] }
  0x39   : > { %v643_v25 = vld [vmem:[%s4772_s7 + $0xf9] sm:$0xff]  ;;  %v645_v33 = vld [vmem:[%s4772_s7 + $0x109] sm:$0xff]  ;;  %v4992_v38 = vpack.c.bf16 %v1039_v31, %v1038_v30  ;;  %v646_v40 = vld [vmem:[%s4772_s7 + $0x111] sm:$0xff] }
  0x3a   : > { %v664_v39 = vpack.c.bf16 %v645_v33, %v644_v32  ;;  %v1040_v41 = vld [vmem:[%s4772_s7 + $0xf2] sm:$0xff]  ;;  %v1041_v42 = vld [vmem:[%s4772_s7 + $0xfa] sm:$0xff]  ;;  %v1042_v44 = vld [vmem:[%s4772_s7 + $0x102] sm:$0xff] }
  0x3b   : > { %v647_v43 = vld [vmem:[%s4772_s7 + $0x119] sm:$0xff]  ;;  %v1043_v45 = vld [vmem:[%s4772_s7 + $0x10a] sm:$0xff] }
  0x3c   : > { %4241 = vmatmul.mubr.msk.bf16.gmra.mxu0 %vm304_vm1, %v258_v6  ;;  %v4954_v6 = vpack.c.bf16 %v1029_v0, %v1028_v63  ;;  %v5008_v50 = vpack.c.bf16 %v1043_v45, %v1042_v44  ;;  %v1044_v51 = vld [vmem:[%s4772_s7 + $0x112] sm:$0xff]  ;;  %v1045_v52 = vld [vmem:[%s4772_s7 + $0x11a] sm:$0xff] }
  0x3d   : > { %4263 = vmatmul.mubr.msk.bf16.vlgmr.msra.gmra.mxu1 %vm304_vm1, %v649_v7  ;;  %4300 = vmatprep.mubr.msk.bf16.mxu0 %vm304_vm1, %v1046_v8  ;;  %v659_v7 = vpack.c.bf16 %v635_v1, %v634_v62  ;;  %v4956_v8 = vpack.c.bf16 %v1031_v3, %v1030_v2  ;;  %v1806_v53 = vld [vmem:[%s4772_s7 + $0x13] sm:$0xff]  ;;  %v1807_v54 = vld [vmem:[%s4772_s7 + $0x1b] sm:$0xff]  ;;  %v5021_v55 = vpack.c.bf16 %v1045_v52, %v1044_v51  ;;  %v5049_v1 = vld [vmem:[%s5882_s1 + $0x10] sm:$0x3] }
  0x3e   : > { %4337 = vmatpush3.bf16.msra.mxu1 %v1555_v10  ;;  %4266 = vmatprep.mubr.msk.bf16.mxu1 %vm304_vm1, %v650_v9  ;;  %v660_v9 = vpack.c.bf16 %v637_v5, %v636_v4  ;;  %v638_v10 = vld [vmem:[%s4772_s7 + $0xd1] sm:$0xff]  ;;  %v1842_v56 = vpack.c.bf16 %v1807_v54, %v1806_v53  ;;  %v1811_v62 = vld [vmem:[%s4772_s7 + $0x3b] sm:$0xff]  ;;  %v1840_v51 = vld [vmem:[%s4772_s7 + $0x123] sm:$0xff] }
  0x3f   : > { %4572 = vmatprep.subr.msk.bf16.mxu1 %vm359_vm0, %v4858_v11  ;;  %v1810_v11 = vld [vmem:[%s4772_s7 + $0x33] sm:$0xff]  ;;  %v1813_v2 = vld [vmem:[%s4772_s7 + $0x4b] sm:$0xff]  ;;  %v1815_v3 = vld [vmem:[%s4772_s7 + $0x5b] sm:$0xff] }
  0x40   : > { %v1844_v0 = vpack.c.bf16 %v1811_v62, %v1810_v11  ;;  %v1821_v13 = vld [vmem:[%s4772_s7 + $0x8b] sm:$0xff]  ;;  %v1834_v31 = vld [vmem:[%s4772_s7 + $0xf3] sm:$0xff]  ;;  %v1835_v32 = vld [vmem:[%s4772_s7 + $0xfb] sm:$0xff] }
  0x41   : > { %v1833_v30 = vld [vmem:[%s4772_s7 + $0xeb] sm:$0xff]  ;;  %v2205_v44 = vld [vmem:[%s4772_s7 + $0x1c] sm:$0xff] }
  0x42   : > { %v1841_v52 = vld [vmem:[%s4772_s7 + $0x12b] sm:$0xff] }
  0x43   : > { %v2206_v53 = vld [vmem:[%s4772_s7 + $0x24] sm:$0xff]  ;;  %v2207_v54 = vld [vmem:[%s4772_s7 + $0x2c] sm:$0xff] }
  0x44   : > { %4301 = vmatmul.mubr.msk.bf16.vlgmr.msra.gmra.mxu0 %vm304_vm1, %v4873_v20  ;;  %v2210_v62 = vld [vmem:[%s4772_s7 + $0x44] sm:$0xff] }
  0x45   : > { %4267 = vmatmul.mubr.msk.bf16.gmra.mxu1 %vm304_vm1, %v651_v21  ;;  %4375 = vmatpush3.bf16.msra.mxu0 %v1953_v22  ;;  %v661_v21 = vpack.c.bf16 %v639_v14, %v638_v10  ;;  %v4974_v22 = vpack.c.bf16 %v1035_v16, %v1034_v15  ;;  %v1823_v14 = vld [vmem:[%s4772_s7 + $0x9b] sm:$0xff] }
  0x46   : > { %4270 = vmatprep.mubr.msk.bf16.mxu1 %vm304_vm1, %v652_v23  ;;  %4304 = vmatprep.mubr.msk.bf16.mxu0 %vm304_vm1, %v4877_v24  ;;  %v662_v23 = vpack.c.bf16 %v641_v18, %v640_v17  ;;  %v1825_v17 = vld [vmem:[%s4772_s7 + $0xab] sm:$0xff]  ;;  %v1827_v18 = vld [vmem:[%s4772_s7 + $0xbb] sm:$0xff] }
  0x47   : > { %4573 = vmatprep.subr.msk.bf16.mxu0 %vm359_vm0, %v4884_v26 }
  0x4c   : > { %4305 = vmatmul.mubr.msk.bf16.gmra.mxu0 %vm304_vm1, %v4900_v34 }
  0x4d   : > { %4271 = vmatmul.mubr.msk.bf16.gmra.mxu1 %vm304_vm1, %v653_v35  ;;  %4308 = vmatprep.mubr.msk.bf16.mxu0 %vm304_vm1, %v4902_v36  ;;  %v4990_v35 = vpack.c.bf16 %v1037_v29, %v1036_v28  ;;  %v1831_v28 = vld [vmem:[%s4772_s7 + $0xdb] sm:$0xff] }
  0x4e   : > { %4274 = vmatprep.mubr.msk.bf16.mxu1 %vm304_vm1, %v654_v37  ;;  %v663_v37 = vpack.c.bf16 %v643_v25, %v642_v27  ;;  %v1829_v27 = vld [vmem:[%s4772_s7 + $0xcb] sm:$0xff] }
  0x54   : > { %4309 = vmatmul.mubr.msk.bf16.gmra.mxu0 %vm304_vm1, %v4918_v46 }
  0x55   : > { %4275 = vmatmul.mubr.msk.bf16.gmra.mxu1 %vm304_vm1, %v655_v47  ;;  %4312 = vmatprep.mubr.msk.bf16.mxu0 %vm304_vm1, %v4920_v48  ;;  %v5006_v47 = vpack.c.bf16 %v1041_v42, %v1040_v41  ;;  %v1838_v41 = vld [vmem:[%s4772_s7 + $0x113] sm:$0xff]  ;;  %v1839_v42 = vld [vmem:[%s4772_s7 + $0x11b] sm:$0xff] }
  0x56   : > { %4278 = vmatprep.mubr.msk.bf16.mxu1 %vm304_vm1, %v656_v49  ;;  %v665_v49 = vpack.c.bf16 %v647_v43, %v646_v40  ;;  %v1443_v40 = vld [vmem:[%s4772_s7 + $0x12a] sm:$0xff]  ;;  %v2204_v43 = vld [vmem:[%s4772_s7 + $0x14] sm:$0xff] }
  0x5c   : > { %4313 = vmatmul.mubr.msk.bf16.gmra.mxu0 %vm304_vm1, %v4936_v58 }
  0x5d   : > { %4279 = vmatmul.mubr.msk.bf16.gmra.mxu1 %vm304_vm1, %v657_v59  ;;  %4316 = vmatprep.mubr.msk.bf16.mxu0 %vm304_vm1, %v4938_v60  ;;  %v5030_v59 = vld [vmem:[%s5882_s1 + $0xe] sm:$0x3] }
  0x5e   : > { %4282 = vmatprep.mubr.msk.bf16.mxu1 %vm304_vm1, %v658_v61  ;;  %v1809_v61 = vld [vmem:[%s4772_s7 + $0x2b] sm:$0xff]  ;;  %v3147_v11 = vsel %vm359_vm0, %v5030_v59, 0 }
  0x64   : > { %4317 = vmatmul.mubr.msk.bf16.gmra.mxu0 %vm304_vm1, %v4954_v6 }
  0x65   : > { %4283 = vmatmul.mubr.msk.bf16.gmra.mxu1 %vm304_vm1, %v659_v7  ;;  %4320 = vmatprep.mubr.msk.bf16.mxu0 %vm304_vm1, %v4956_v8  ;;  %v1818_v7 = vld [vmem:[%s4772_s7 + $0x73] sm:$0xff] }
  0x66   : > { %4286 = vmatprep.mubr.msk.bf16.mxu1 %vm304_vm1, %v660_v9  ;;  %v1819_v9 = vld [vmem:[%s4772_s7 + $0x7b] sm:$0xff] }
  0x67   : > { %v1848_v12 = vpack.c.bf16 %v1819_v9, %v1818_v7 }
  0x6c   : > { %4321 = vmatmul.mubr.msk.bf16.gmra.mxu0 %vm304_vm1, %v4972_v19 }
  0x6d   : > { %4287 = vmatmul.mubr.msk.bf16.gmra.mxu1 %vm304_vm1, %v661_v21  ;;  %4324 = vmatprep.mubr.msk.bf16.mxu0 %vm304_vm1, %v4974_v22 }
  0x6e   : > { %4290 = vmatprep.mubr.msk.bf16.mxu1 %vm304_vm1, %v662_v23 }
  0x74   : > { %4325 = vmatmul.mubr.msk.bf16.gmra.mxu0 %vm304_vm1, %v4990_v35 }
  0x75   : > { %4291 = vmatmul.mubr.msk.bf16.gmra.mxu1 %vm304_vm1, %v663_v37  ;;  %4328 = vmatprep.mubr.msk.bf16.mxu0 %vm304_vm1, %v4992_v38  ;;  %v1442_v37 = vld [vmem:[%s4772_s7 + $0x122] sm:$0xff] }
  0x76   : > { %4294 = vmatprep.mubr.msk.bf16.mxu1 %vm304_vm1, %v664_v39  ;;  %v1837_v39 = vld [vmem:[%s4772_s7 + $0x10b] sm:$0xff] }
  0x7c   : > { %4329 = vmatmul.mubr.msk.bf16.gmra.mxu0 %vm304_vm1, %v5006_v47 }
  0x7d   : > { %4295 = vmatmul.mubr.msk.bf16.gmra.mxu1 %vm304_vm1, %v665_v49  ;;  %4332 = vmatprep.mubr.msk.bf16.mxu0 %vm304_vm1, %v5008_v50  ;;  %v1858_v49 = vpack.c.bf16 %v1839_v42, %v1838_v41  ;;  %v2228_v42 = vld [vmem:[%s4772_s7 + $0xd4] sm:$0xff] }
  0x7e   : > { %4338 = vmatprep.mubr.msk.bf16.mxu1 %vm304_vm1, %v4873_v20  ;;  %v1808_v20 = vld [vmem:[%s4772_s7 + $0x23] sm:$0xff] }
  0x7f   : > { %v1843_v63 = vpack.c.bf16 %v1809_v61, %v1808_v20  ;;  %v2241_v20 = vpack.c.bf16 %v2207_v54, %v2206_v53  ;;  %v5234_v53 = vld [vmem:[%s5883_s2] ss:$0 sm:$0xff] }
  0x84   : > { %4333 = vmatmul.mubr.msk.bf16.gmra.mxu0 %vm304_vm1, %v5021_v55 }
  0x85   : > { %4339 = vmatmul.mubr.msk.bf16.vlgmr.msra.gmra.mxu1 %vm304_vm1, %v4877_v24  ;;  %4376 = vmatprep.mubr.msk.bf16.mxu0 %vm304_vm1, %v1842_v56  ;;  %v2749_v24 = vsel %vm359_vm0, %v4884_v26, 0  ;;  %v1814_v26 = vld [vmem:[%s4772_s7 + $0x53] sm:$0xff]  ;;  %v2209_v56 = vld [vmem:[%s4772_s7 + $0x3c] sm:$0xff] }
  0x86   : > { %4413 = vmatpush3.bf16.msra.mxu1 %v2351_v57  ;;  %4342 = vmatprep.mubr.msk.bf16.mxu1 %vm304_vm1, %v4900_v34  ;;  %v1812_v34 = vld [vmem:[%s4772_s7 + $0x43] sm:$0xff]  ;;  %v1846_v5 = vpack.c.bf16 %v1815_v3, %v1814_v26  ;;  %v1859_v57 = vpack.c.bf16 %v1841_v52, %v1840_v51  ;;  %v2215_v3 = vld [vmem:[%s4772_s7 + $0x6c] sm:$0xff] }
  0x87   : > { %4574 = vmatprep.subr.msk.bf16.mxu1 %vm359_vm0, %v5030_v59  ;;  %v1845_v4 = vpack.c.bf16 %v1813_v2, %v1812_v34  ;;  %v3545_v59 = vsel %vm359_vm0, %v5049_v1, 0  ;;  %v2214_v26 = vld [vmem:[%s4772_s7 + $0x64] sm:$0xff] }
  0x8c   : > { %4377 = vmatmul.mubr.msk.bf16.vlgmr.msra.gmra.mxu0 %vm304_vm1, %v1843_v63  ;;  %v2211_v63 = vld [vmem:[%s4772_s7 + $0x4c] sm:$0xff] }
  0x8d   : > { %4343 = vmatmul.mubr.msk.bf16.gmra.mxu1 %vm304_vm1, %v4902_v36  ;;  %4451 = vmatpush3.bf16.msra.mxu0 %v2749_v24  ;;  %v1816_v36 = vld [vmem:[%s4772_s7 + $0x63] sm:$0xff]  ;;  %v2212_v24 = vld [vmem:[%s4772_s7 + $0x54] sm:$0xff]  ;;  %v2243_v34 = vpack.c.bf16 %v2211_v63, %v2210_v62 }
  0x8e   : > { %4346 = vmatprep.mubr.msk.bf16.mxu1 %vm304_vm1, %v4918_v46  ;;  %4380 = vmatprep.mubr.msk.bf16.mxu0 %vm304_vm1, %v1844_v0  ;;  %v1817_v46 = vld [vmem:[%s4772_s7 + $0x6b] sm:$0xff]  ;;  %v2213_v0 = vld [vmem:[%s4772_s7 + $0x5c] sm:$0xff] }
  0x8f   : > { %4575 = vmatprep.subr.msk.bf16.mxu0 %vm359_vm0, %v5049_v1  ;;  %v1847_v10 = vpack.c.bf16 %v1817_v46, %v1816_v36  ;;  %v2244_v2 = vpack.c.bf16 %v2213_v0, %v2212_v24  ;;  %v2245_v36 = vpack.c.bf16 %v2215_v3, %v2214_v26  ;;  %v2233_v62 = vld [vmem:[%s4772_s7 + $0xfc] sm:$0xff] }
  0x94   : > { %4381 = vmatmul.mubr.msk.bf16.gmra.mxu0 %vm304_vm1, %v1845_v4  ;;  %v2216_v4 = vld [vmem:[%s4772_s7 + $0x74] sm:$0xff] }
  0x95   : > { %4347 = vmatmul.mubr.msk.bf16.gmra.mxu1 %vm304_vm1, %v4920_v48  ;;  %4384 = vmatprep.mubr.msk.bf16.mxu0 %vm304_vm1, %v1846_v5  ;;  %v1820_v48 = vld [vmem:[%s4772_s7 + $0x83] sm:$0xff] }
  0x96   : > { %4350 = vmatprep.mubr.msk.bf16.mxu1 %vm304_vm1, %v4936_v58  ;;  %v1822_v58 = vld [vmem:[%s4772_s7 + $0x93] sm:$0xff]  ;;  %v1849_v15 = vpack.c.bf16 %v1821_v13, %v1820_v48  ;;  %v2217_v5 = vld [vmem:[%s4772_s7 + $0x7c] sm:$0xff] }
  0x97   : > { %v1850_v16 = vpack.c.bf16 %v1823_v14, %v1822_v58  ;;  %v2246_v1 = vpack.c.bf16 %v2217_v5, %v2216_v4  ;;  %v2220_v13 = vld [vmem:[%s4772_s7 + $0x94] sm:$0xff]  ;;  %v2221_v58 = vld [vmem:[%s4772_s7 + $0x9c] sm:$0xff] }
  0x9c   : > { %4385 = vmatmul.mubr.msk.bf16.gmra.mxu0 %vm304_vm1, %v1847_v10  ;;  %v2218_v10 = vld [vmem:[%s4772_s7 + $0x84] sm:$0xff] }
  0x9d   : > { %4351 = vmatmul.mubr.msk.bf16.gmra.mxu1 %vm304_vm1, %v4938_v60  ;;  %4388 = vmatprep.mubr.msk.bf16.mxu0 %vm304_vm1, %v1848_v12  ;;  %v1824_v60 = vld [vmem:[%s4772_s7 + $0xa3] sm:$0xff]  ;;  %v2219_v12 = vld [vmem:[%s4772_s7 + $0x8c] sm:$0xff] }
  0x9e   : > { %4354 = vmatprep.mubr.msk.bf16.mxu1 %vm304_vm1, %v4954_v6  ;;  %v1826_v6 = vld [vmem:[%s4772_s7 + $0xb3] sm:$0xff]  ;;  %v1851_v21 = vpack.c.bf16 %v1825_v17, %v1824_v60  ;;  %v2248_v17 = vpack.c.bf16 %v2221_v58, %v2220_v13 }
  0x9f   : > { %v1852_v23 = vpack.c.bf16 %v1827_v18, %v1826_v6  ;;  %v2235_v58 = vld [vmem:[%s4772_s7 + $0x10c] sm:$0xff] }
  0xa4   : > { %4389 = vmatmul.mubr.msk.bf16.gmra.mxu0 %vm304_vm1, %v1849_v15 }
  0xa5   : > { %4355 = vmatmul.mubr.msk.bf16.gmra.mxu1 %vm304_vm1, %v4956_v8  ;;  %4392 = vmatprep.mubr.msk.bf16.mxu0 %vm304_vm1, %v1850_v16  ;;  %v1828_v8 = vld [vmem:[%s4772_s7 + $0xc3] sm:$0xff]  ;;  %v2247_v16 = vpack.c.bf16 %v2219_v12, %v2218_v10 }
  0xa6   : > { %4358 = vmatprep.mubr.msk.bf16.mxu1 %vm304_vm1, %v4972_v19  ;;  %v1830_v19 = vld [vmem:[%s4772_s7 + $0xd3] sm:$0xff]  ;;  %v1853_v29 = vpack.c.bf16 %v1829_v27, %v1828_v8  ;;  %v2222_v8 = vld [vmem:[%s4772_s7 + $0xa4] sm:$0xff] }
  0xa7   : > { %v1854_v25 = vpack.c.bf16 %v1831_v28, %v1830_v19  ;;  %v2223_v27 = vld [vmem:[%s4772_s7 + $0xac] sm:$0xff]  ;;  %v2224_v28 = vld [vmem:[%s4772_s7 + $0xb4] sm:$0xff] }
  0xac   : > { %4393 = vmatmul.mubr.msk.bf16.gmra.mxu0 %vm304_vm1, %v1851_v21 }
  0xad   : > { %4359 = vmatmul.mubr.msk.bf16.gmra.mxu1 %vm304_vm1, %v4974_v22  ;;  %4396 = vmatprep.mubr.msk.bf16.mxu0 %vm304_vm1, %v1852_v23  ;;  %v1832_v22 = vld [vmem:[%s4772_s7 + $0xe3] sm:$0xff] }
  0xae   : > { %4362 = vmatprep.mubr.msk.bf16.mxu1 %vm304_vm1, %v4990_v35  ;;  %v1855_v33 = vpack.c.bf16 %v1833_v30, %v1832_v22  ;;  %v1856_v35 = vpack.c.bf16 %v1835_v32, %v1834_v31  ;;  %v2249_v30 = vpack.c.bf16 %v2223_v27, %v2222_v8  ;;  %v2237_v8 = vld [vmem:[%s4772_s7 + $0x11c] sm:$0xff] }
  0xb4   : > { %4397 = vmatmul.mubr.msk.bf16.gmra.mxu0 %vm304_vm1, %v1853_v29  ;;  %v2225_v29 = vld [vmem:[%s4772_s7 + $0xbc] sm:$0xff] }
  0xb5   : > { %4363 = vmatmul.mubr.msk.bf16.gmra.mxu1 %vm304_vm1, %v4992_v38  ;;  %4400 = vmatprep.mubr.msk.bf16.mxu0 %vm304_vm1, %v1854_v25  ;;  %v1836_v38 = vld [vmem:[%s4772_s7 + $0x103] sm:$0xff]  ;;  %v2250_v32 = vpack.c.bf16 %v2225_v29, %v2224_v28 }
  0xb6   : > { %4366 = vmatprep.mubr.msk.bf16.mxu1 %vm304_vm1, %v5006_v47  ;;  %v1857_v45 = vpack.c.bf16 %v1837_v39, %v1836_v38  ;;  %v1461_v47 = vpack.c.bf16 %v1443_v40, %v1442_v37  ;;  %v2226_v39 = vld [vmem:[%s4772_s7 + $0xc4] sm:$0xff]  ;;  %v2227_v40 = vld [vmem:[%s4772_s7 + $0xcc] sm:$0xff] }
  0xbc   : > { %4401 = vmatmul.mubr.msk.bf16.gmra.mxu0 %vm304_vm1, %v1855_v33 }
  0xbd   : > { %4367 = vmatmul.mubr.msk.bf16.gmra.mxu1 %vm304_vm1, %v5008_v50  ;;  %4404 = vmatprep.mubr.msk.bf16.mxu0 %vm304_vm1, %v1856_v35  ;;  %v2240_v50 = vpack.c.bf16 %v2205_v44, %v2204_v43  ;;  %v2229_v43 = vld [vmem:[%s4772_s7 + $0xdc] sm:$0xff] }
  0xbe   : > { %4370 = vmatprep.mubr.msk.bf16.mxu1 %vm304_vm1, %v5021_v55  ;;  %v2208_v55 = vld [vmem:[%s4772_s7 + $0x34] sm:$0xff] }
  0xbf   : > { %v2242_v61 = vpack.c.bf16 %v2209_v56, %v2208_v55 }
  0xc4   : > { %4405 = vmatmul.mubr.msk.bf16.gmra.mxu0 %vm304_vm1, %v1857_v45 }
  0xc5   : > { %4371 = vmatmul.mubr.msk.bf16.gmra.mxu1 %vm304_vm1, %v1461_v47  ;;  %4408 = vmatprep.mubr.msk.bf16.mxu0 %vm304_vm1, %v1858_v49  ;;  %v2251_v47 = vpack.c.bf16 %v2227_v40, %v2226_v39 }
  0xc6   : > { %4414 = vmatprep.mubr.msk.bf16.mxu1 %vm304_vm1, %v2240_v50  ;;  %v2252_v50 = vpack.c.bf16 %v2229_v43, %v2228_v42 }
  0xcc   : > { %4409 = vmatmul.mubr.msk.bf16.gmra.mxu0 %vm304_vm1, %v1859_v57  ;;  %v2230_v57 = vld [vmem:[%s4772_s7 + $0xe4] sm:$0xff] }
  0xcd   : > { %4415 = vmatmul.mubr.msk.bf16.vlgmr.msra.gmra.mxu1 %vm304_vm1, %v2241_v20  ;;  %4452 = vmatprep.mubr.msk.bf16.mxu0 %vm304_vm1, %v2241_v20  ;;  %v2231_v20 = vld [vmem:[%s4772_s7 + $0xec] sm:$0xff] }
  0xce   : > { %4489 = vmatpush3.bf16.msra.mxu1 %v3147_v11  ;;  %4418 = vmatprep.mubr.msk.bf16.mxu1 %vm304_vm1, %v2242_v61  ;;  %v2232_v11 = vld [vmem:[%s4772_s7 + $0xf4] sm:$0xff] }
  0xcf   : > { %v2254_v26 = vpack.c.bf16 %v2233_v62, %v2232_v11  ;;  %v2239_v11 = vld [vmem:[%s4772_s7 + $0x12c] sm:$0xff] }
  0xd4   : > { %4453 = vmatmul.mubr.msk.bf16.vlgmr.msra.gmra.mxu0 %vm304_vm1, %v2242_v61 }
  0xd5   : > { %4419 = vmatmul.mubr.msk.bf16.gmra.mxu1 %vm304_vm1, %v2243_v34  ;;  %4527 = vmatpush3.bf16.msra.mxu0 %v3545_v59 }
  0xd6   : > { %4422 = vmatprep.mubr.msk.bf16.mxu1 %vm304_vm1, %v2244_v2  ;;  %4456 = vmatprep.mubr.msk.bf16.mxu0 %vm304_vm1, %v2243_v34  ;;  %v2253_v34 = vpack.c.bf16 %v2231_v20, %v2230_v57 }
  0xdc   : > { %v5156_v46 = vpop.f32.mrf.mxu0  ;;  %4457 = vmatmul.mubr.msk.bf16.gmra.mxu0 %vm304_vm1, %v2244_v2 }
  0xdd   : > { %v5159_v7 = vpop.f32.mrf.mxu1  ;;  %4423 = vmatmul.mubr.msk.bf16.gmra.mxu1 %vm304_vm1, %v2245_v36  ;;  %4460 = vmatprep.mubr.msk.bf16.mxu0 %vm304_vm1, %v2245_v36  ;;  %v542_v4 = vadd.f32 %v5156_v46, %v5234_v53  ;;  %v2234_v46 = vld [vmem:[%s4772_s7 + $0x104] sm:$0xff] }
  0xde   : > { %v5163_v9 = vpop.f32.mrf.mxu0  ;;  %4426 = vmatprep.mubr.msk.bf16.mxu1 %vm304_vm1, %v2246_v1 }
  0xdf   : > { %v5168_v48 = vpop.f32.mrf.mxu1  ;;  %v540_v10 = vadd.f32 %v5234_v53, %v5163_v9 }
  0xe0   : > { %v5172_v14 = vpop.f32.mrf.mxu0 }
  0xe1   : > { %v5174_v15 = vpop.f32.mrf.mxu1  ;;  %v543_v27 = vadd.f32 %v5172_v14, %v5234_v53 }
  0xe2   : > { %v5176_v60 = vpop.f32.mrf.mxu0 }
  0xe3   : > { %v5178_v6 = vpop.f32.mrf.mxu1  ;;  %v541_v9 = vadd.f32 %v5234_v53, %v5176_v60 }
  0xe4   : > { %v5180_v18 = vpop.f32.mrf.mxu0  ;;  %4461 = vmatmul.mubr.msk.bf16.gmra.mxu0 %vm304_vm1, %v2246_v1 }
  0xe5   : > { %v5183_v21 = vpop.f32.mrf.mxu1  ;;  %4427 = vmatmul.mubr.msk.bf16.gmra.mxu1 %vm304_vm1, %v2247_v16  ;;  %4464 = vmatprep.mubr.msk.bf16.mxu0 %vm304_vm1, %v2247_v16 }
  0xe6   : > { %v5187_v23 = vpop.f32.mrf.mxu0  ;;  %4430 = vmatprep.mubr.msk.bf16.mxu1 %vm304_vm1, %v2248_v17 }
  0xe7   : > { %v5192_v19 = vpop.f32.mrf.mxu1  ;;  %v544_v60 = vadd.f32 %v5234_v53, %v5187_v23 }
  0xe8   : > { %v5196_v25 = vpop.f32.mrf.mxu0 }
  0xe9   : > { %v5198_v22 = vpop.f32.mrf.mxu1 }
  0xea   : > { %v5200_v31 = vpop.f32.mrf.mxu0 }
  0xeb   : > { %v5202_v33 = vpop.f32.mrf.mxu1 }
  0xec   : > { %v5204_v35 = vpop.f32.mrf.mxu0  ;;  %4465 = vmatmul.mubr.msk.bf16.gmra.mxu0 %vm304_vm1, %v2248_v17  ;;  %v2236_v17 = vld [vmem:[%s4772_s7 + $0x114] sm:$0xff] }
  0xed   : > { %v5207_v37 = vpop.f32.mrf.mxu1  ;;  %4431 = vmatmul.mubr.msk.bf16.gmra.mxu1 %vm304_vm1, %v2249_v30  ;;  %4468 = vmatprep.mubr.msk.bf16.mxu0 %vm304_vm1, %v2249_v30  ;;  %v2256_v42 = vpack.c.bf16 %v2237_v8, %v2236_v17 }
  0xee   : > { %v5211_v38 = vpop.f32.mrf.mxu0  ;;  %4434 = vmatprep.mubr.msk.bf16.mxu1 %vm304_vm1, %v2250_v32 }
  0xef   : > { %v5216_v41 = vpop.f32.mrf.mxu1 }
  0xf0   : > { %v5220_v44 = vpop.f32.mrf.mxu0 }
  0xf1   : > { %v5222_v45 = vpop.f32.mrf.mxu1 }
  0xf2   : > { %v5224_v49 = vpop.f32.mrf.mxu0 }
  0xf3   : > { %v5226_v51 = vpop.f32.mrf.mxu1 }
  0xf4   : > { %v5228_v52 = vpop.f32.mrf.mxu0  ;;  %4469 = vmatmul.mubr.msk.bf16.gmra.mxu0 %vm304_vm1, %v2250_v32  ;;  %v2255_v32 = vpack.c.bf16 %v2235_v58, %v2234_v46  ;;  %v545_v46 = vadd.f32 %v5234_v53, %v5200_v31 }
  0xf5   : > { %v4258_v54 = vpop.f32.mrf.mxu1  ;;  %4435 = vmatmul.mubr.msk.bf16.gmra.mxu1 %vm304_vm1, %v2251_v47  ;;  %4472 = vmatprep.mubr.msk.bf16.mxu0 %vm304_vm1, %v2251_v47  ;;  %v546_v47 = vadd.f32 %v5180_v18, %v5234_v53  ;;  %v2238_v18 = vld [vmem:[%s4772_s7 + $0x124] sm:$0xff] }
  0xf6   : > { %v5239_v55 = vadd.f32 %v4258_v54, %v5234_v53  ;;  %v5241_v56 = vpop.f32.mrf.mxu0  ;;  %4438 = vmatprep.mubr.msk.bf16.mxu1 %vm304_vm1, %v2252_v50  ;;  %v2257_v23 = vpack.c.bf16 %v2239_v11, %v2238_v18  ;;  %v3005_v18 = vld [vmem:[%s4772_s7 + $0x4d] sm:$0xff]  ;;  %v551_v11 = vadd.f32 %v5220_v44, %v5234_v53  ;;  %v554_v44 = vadd.f32 %v5228_v52, %v5234_v53 }
  0xf7   : > { %v525_v61 = vpop.f32.mrf.mxu1  ;;  %v552_v52 = vadd.f32 %v5234_v53, %v5241_v56 }
  0xf8   : > { %v5249_v63 = vadd.f32 %v5234_v53, %v525_v61  ;;  %v5251_v24 = vpop.f32.mrf.mxu0 }
  0xf9   : > { %v4259_v0 = vpop.f32.mrf.mxu1 }
  0xfa   : > { %v5254_v59 = vadd.f32 %v4259_v0, %v5234_v53  ;;  %v5256_v2 = vpop.f32.mrf.mxu0 }
  0xfb   : > { %v528_v3 = vpop.f32.mrf.mxu1 }
  0xfc   : > { %v5261_v5 = vadd.f32 %v5234_v53, %v528_v3  ;;  %v5263_v36 = vpop.f32.mrf.mxu0  ;;  %4473 = vmatmul.mubr.msk.bf16.gmra.mxu0 %vm304_vm1, %v2252_v50  ;;  %v547_v3 = vadd.f32 %v5196_v25, %v5234_v53  ;;  %v550_v25 = vadd.f32 %v5204_v35, %v5234_v53  ;;  %v548_v35 = vadd.f32 %v5234_v53, %v5211_v38 }
  0xfd   : > { %v4264_v1 = vpop.f32.mrf.mxu1  ;;  %4439 = vmatmul.mubr.msk.bf16.gmra.mxu1 %vm304_vm1, %v2253_v34  ;;  %4476 = vmatprep.mubr.msk.bf16.mxu0 %vm304_vm1, %v2253_v34  ;;  %v3000_v34 = vld [vmem:[%s4772_s7 + $0x25] sm:$0xff] }
  0xfe   : > { %v940_v12 = vadd.f32 %v4264_v1, %v542_v4  ;;  %v5270_v13 = vpop.f32.mrf.mxu0  ;;  %4442 = vmatprep.mubr.msk.bf16.mxu1 %vm304_vm1, %v2254_v26 }
  0xff   : > { %v795_v16 = vpop.f32.mrf.mxu1 }
 0x100   : > { %v938_v28 = vadd.f32 %v795_v16, %v540_v10  ;;  %v5279_v29 = vpop.f32.mrf.mxu0 }
 0x101   : > { %v4265_v30 = vpop.f32.mrf.mxu1 }
 0x102   : > { %v941_v39 = vadd.f32 %v4265_v30, %v543_v27  ;;  %v5283_v40 = vpop.f32.mrf.mxu0 }
 0x103   : > { %v798_v43 = vpop.f32.mrf.mxu1 }
 0x104   : > { %v939_v14 = vadd.f32 %v798_v43, %v541_v9  ;;  %v4302_v50 = vpop.f32.mrf.mxu0  ;;  %4477 = vmatmul.mubr.msk.bf16.gmra.mxu0 %vm304_vm1, %v2254_v26  ;;  %v3001_v26 = vld [vmem:[%s4772_s7 + $0x2d] sm:$0xff]  ;;  %v3002_v43 = vld [vmem:[%s4772_s7 + $0x35] sm:$0xff] }
 0x105   : > { %v4268_v54 = vpop.f32.mrf.mxu1  ;;  %v5288_v57 = vadd.f32 %v4302_v50, %v940_v12  ;;  %4443 = vmatmul.mubr.msk.bf16.gmra.mxu1 %vm304_vm1, %v2255_v32  ;;  %4480 = vmatprep.mubr.msk.bf16.mxu0 %vm304_vm1, %v2255_v32  ;;  %v3036_v17 = vpack.c.bf16 %v3001_v26, %v3000_v34  ;;  %v2636_v9 = vld [vmem:[%s4772_s7 + $0x134] sm:$0xff]  ;;  %v3398_v50 = vld [vmem:[%s4772_s7 + $0x26] sm:$0xff] }
 0x106   : > { %v944_v20 = vadd.f32 %v4268_v54, %v546_v47  ;;  %v1193_v61 = vpop.f32.mrf.mxu0  ;;  %4446 = vmatprep.mubr.msk.bf16.mxu1 %vm304_vm1, %v2256_v42  ;;  %v3399_v54 = vld [vmem:[%s4772_s7 + $0x2e] sm:$0xff] }
 0x107   : > { %v811_v62 = vpop.f32.mrf.mxu1  ;;  %v5297_v0 = vadd.f32 %v1193_v61, %v938_v28  ;;  %v3004_v61 = vld [vmem:[%s4772_s7 + $0x45] sm:$0xff] }
 0x108   : > { %v942_v4 = vadd.f32 %v811_v62, %v544_v60  ;;  %v4303_v1 = vpop.f32.mrf.mxu0 }
 0x109   : > { %v4269_v10 = vpop.f32.mrf.mxu1  ;;  %v5303_v12 = vadd.f32 %v4303_v1, %v941_v39  ;;  %v2637_v39 = vld [vmem:[%s4772_s7 + $0x13c] sm:$0xff] }
 0x10a   : > { %v945_v58 = vadd.f32 %v4269_v10, %v547_v3  ;;  %v1196_v16 = vpop.f32.mrf.mxu0  ;;  %v2655_v26 = vpack.c.bf16 %v2637_v39, %v2636_v9  ;;  %v3434_v10 = vpack.c.bf16 %v3399_v54, %v3398_v50  ;;  %v3401_v9 = vld [vmem:[%s4772_s7 + $0x3e] sm:$0xff] }
 0x10b   : > { %v814_v8 = vpop.f32.mrf.mxu1  ;;  %v5307_v27 = vadd.f32 %v1196_v16, %v939_v14  ;;  %v3038_v16 = vpack.c.bf16 %v3005_v18, %v3004_v61  ;;  %v3008_v54 = vld [vmem:[%s4772_s7 + $0x65] sm:$0xff]  ;;  %v555_v61 = vadd.f32 %v5251_v24, %v5234_v53  ;;  %v558_v24 = vadd.f32 %v5263_v36, %v5234_v53 }
 0x10c   : > { %v943_v28 = vadd.f32 %v814_v8, %v545_v46  ;;  %v4306_v30 = vpop.f32.mrf.mxu0  ;;  %4481 = vmatmul.mubr.msk.bf16.gmra.mxu0 %vm304_vm1, %v2256_v42  ;;  %v3003_v42 = vld [vmem:[%s4772_s7 + $0x3d] sm:$0xff]  ;;  %v556_v36 = vadd.f32 %v5234_v53, %v5270_v13 }
 0x10d   : > { %v4272_v32 = vpop.f32.mrf.mxu1  ;;  %v5312_v31 = vadd.f32 %v4306_v30, %v944_v20  ;;  %4447 = vmatmul.mubr.msk.bf16.gmra.mxu1 %vm304_vm1, %v2257_v23  ;;  %4484 = vmatprep.mubr.msk.bf16.mxu0 %vm304_vm1, %v2257_v23  ;;  %v3037_v1 = vpack.c.bf16 %v3003_v42, %v3002_v43  ;;  %v549_v23 = vadd.f32 %v5234_v53, %v5224_v49  ;;  %v3403_v42 = vld [vmem:[%s4772_s7 + $0x4e] sm:$0xff] }
 0x10e   : > { %v948_v47 = vadd.f32 %v4272_v32, %v550_v25  ;;  %v1209_v14 = vpop.f32.mrf.mxu0  ;;  %4490 = vmatprep.mubr.msk.bf16.mxu1 %vm304_vm1, %v3036_v17  ;;  %v3400_v32 = vld [vmem:[%s4772_s7 + $0x36] sm:$0xff] }
 0x10f   : > { %v827_v60 = vpop.f32.mrf.mxu1  ;;  %v5325_v20 = vadd.f32 %v1209_v14, %v942_v4  ;;  %v3402_v14 = vld [vmem:[%s4772_s7 + $0x46] sm:$0xff] }
 0x110   : > { %v946_v62 = vadd.f32 %v827_v60, %v548_v35  ;;  %v4307_v34 = vpop.f32.mrf.mxu0  ;;  %v3007_v35 = vld [vmem:[%s4772_s7 + $0x5d] sm:$0xff]  ;;  %v3009_v60 = vld [vmem:[%s4772_s7 + $0x6d] sm:$0xff] }
 0x111   : > { %v4273_v3 = vpop.f32.mrf.mxu1  ;;  %v5331_v38 = vadd.f32 %v4307_v34, %v945_v58  ;;  %v3435_v34 = vpack.c.bf16 %v3401_v9, %v3400_v32 }
 0x112   : > { %v949_v4 = vadd.f32 %v4273_v3, %v551_v11  ;;  %v1212_v46 = vpop.f32.mrf.mxu0 }
 0x113   : > { %v830_v17 = vpop.f32.mrf.mxu1  ;;  %v5335_v8 = vadd.f32 %v1212_v46, %v943_v28  ;;  %v3006_v28 = vld [vmem:[%s4772_s7 + $0x55] sm:$0xff]  ;;  %v3040_v46 = vpack.c.bf16 %v3009_v60, %v3008_v54  ;;  %v559_v54 = vadd.f32 %v5279_v29, %v5234_v53  ;;  %v562_v29 = vadd.f32 %v5159_v7, %v5234_v53 }
 0x114   : > { %v947_v58 = vadd.f32 %v830_v17, %v549_v23  ;;  %v4310_v25 = vpop.f32.mrf.mxu0  ;;  %4485 = vmatmul.mubr.msk.bf16.gmra.mxu0 %vm304_vm1, %v2655_v26  ;;  %v3039_v3 = vpack.c.bf16 %v3007_v35, %v3006_v28  ;;  %v3405_v28 = vld [vmem:[%s4772_s7 + $0x5e] sm:$0xff]  ;;  %v3407_v35 = vld [vmem:[%s4772_s7 + $0x6e] sm:$0xff]  ;;  %v560_v7 = vadd.f32 %v5234_v53, %v5168_v48 }
 0x115   : > { %v4276_v30 = vpop.f32.mrf.mxu1  ;;  %v5340_v49 = vadd.f32 %v4310_v25, %v948_v47  ;;  %4491 = vmatmul.mubr.msk.bf16.vlgmr.msra.gmra.mxu1 %vm304_vm1, %v3037_v1  ;;  %4528 = vmatprep.mubr.msk.bf16.mxu0 %vm304_vm1, %v3434_v10  ;;  %v3436_v1 = vpack.c.bf16 %v3403_v42, %v3402_v14  ;;  %v553_v10 = vadd.f32 %v5234_v53, %v5256_v2  ;;  %v3012_v42 = vld [vmem:[%s4772_s7 + $0x85] sm:$0xff] }
 0x116   : > { %v952_v39 = vadd.f32 %v4276_v30, %v554_v44  ;;  %v1225_v43 = vpop.f32.mrf.mxu0  ;;  %4494 = vmatprep.mubr.msk.bf16.mxu1 %vm304_vm1, %v3038_v16  ;;  %v3404_v30 = vld [vmem:[%s4772_s7 + $0x56] sm:$0xff] }
 0x117   : > { %v843_v47 = vpop.f32.mrf.mxu1  ;;  %v5353_v50 = vadd.f32 %v1225_v43, %v946_v62  ;;  %v3406_v43 = vld [vmem:[%s4772_s7 + $0x66] sm:$0xff] }
 0x118   : > { %v950_v18 = vadd.f32 %v843_v47, %v552_v52  ;;  %v4311_v11 = vpop.f32.mrf.mxu0  ;;  %v3011_v52 = vld [vmem:[%s4772_s7 + $0x7d] sm:$0xff]  ;;  %v3013_v47 = vld [vmem:[%s4772_s7 + $0x8d] sm:$0xff] }
 0x119   : > { %v4277_v26 = vpop.f32.mrf.mxu1  ;;  %v5359_v56 = vadd.f32 %v4311_v11, %v949_v4  ;;  %v3437_v11 = vpack.c.bf16 %v3405_v28, %v3404_v30 }
 0x11a   : > { %v953_v62 = vadd.f32 %v4277_v26, %v555_v61  ;;  %v1228_v23 = vpop.f32.mrf.mxu0 }
 0x11b   : > { %v846_v16 = vpop.f32.mrf.mxu1  ;;  %v5363_v17 = vadd.f32 %v1228_v23, %v947_v58  ;;  %v3010_v58 = vld [vmem:[%s4772_s7 + $0x75] sm:$0xff]  ;;  %v3042_v23 = vpack.c.bf16 %v3013_v47, %v3012_v42  ;;  %v563_v42 = vadd.f32 %v5174_v15, %v5234_v53  ;;  %v566_v15 = vadd.f32 %v5183_v21, %v5234_v53 }
 0x11c   : > { %v951_v4 = vadd.f32 %v846_v16, %v553_v10  ;;  %v4314_v44 = vpop.f32.mrf.mxu0  ;;  %4529 = vmatmul.mubr.msk.bf16.vlgmr.msra.gmra.mxu0 %vm304_vm1, %v3435_v34  ;;  %v3041_v26 = vpack.c.bf16 %v3011_v52, %v3010_v58  ;;  %v3409_v58 = vld [vmem:[%s4772_s7 + $0x7e] sm:$0xff]  ;;  %v3411_v52 = vld [vmem:[%s4772_s7 + $0x8e] sm:$0xff]  ;;  %v564_v21 = vadd.f32 %v5234_v53, %v5192_v19 }
 0x11d   : > { %v4280_v25 = vpop.f32.mrf.mxu1  ;;  %v5368_v2 = vadd.f32 %v4314_v44, %v952_v39  ;;  %4495 = vmatmul.mubr.msk.bf16.gmra.mxu1 %vm304_vm1, %v3039_v3  ;;  %4532 = vmatprep.mubr.msk.bf16.mxu0 %vm304_vm1, %v3436_v1  ;;  %v3438_v3 = vpack.c.bf16 %v3407_v35, %v3406_v43  ;;  %v557_v1 = vadd.f32 %v5234_v53, %v5283_v40  ;;  %v3016_v35 = vld [vmem:[%s4772_s7 + $0xa5] sm:$0xff] }
 0x11e   : > { %v956_v32 = vadd.f32 %v4280_v25, %v558_v24  ;;  %v1241_v9 = vpop.f32.mrf.mxu0  ;;  %4498 = vmatprep.mubr.msk.bf16.mxu1 %vm304_vm1, %v3040_v46  ;;  %v3408_v25 = vld [vmem:[%s4772_s7 + $0x76] sm:$0xff] }
 0x11f   : > { %v859_v39 = vpop.f32.mrf.mxu1  ;;  %v5381_v14 = vadd.f32 %v1241_v9, %v950_v18  ;;  %v3410_v9 = vld [vmem:[%s4772_s7 + $0x86] sm:$0xff] }
 0x120   : > { %v954_v60 = vadd.f32 %v859_v39, %v556_v36  ;;  %v4315_v61 = vpop.f32.mrf.mxu0  ;;  %v3015_v36 = vld [vmem:[%s4772_s7 + $0x9d] sm:$0xff]  ;;  %v3017_v39 = vld [vmem:[%s4772_s7 + $0xad] sm:$0xff] }
 0x121   : > { %v4281_v34 = vpop.f32.mrf.mxu1  ;;  %v5387_v13 = vadd.f32 %v4315_v61, %v953_v62  ;;  %v3439_v61 = vpack.c.bf16 %v3409_v58, %v3408_v25 }
 0x122   : > { %v957_v18 = vadd.f32 %v4281_v34, %v559_v54  ;;  %v1244_v10 = vpop.f32.mrf.mxu0 }
 0x123   : > { %v862_v46 = vpop.f32.mrf.mxu1  ;;  %v5391_v16 = vadd.f32 %v1244_v10, %v951_v4  ;;  %v3014_v4 = vld [vmem:[%s4772_s7 + $0x95] sm:$0xff]  ;;  %v3044_v10 = vpack.c.bf16 %v3017_v39, %v3016_v35  ;;  %v567_v35 = vadd.f32 %v5198_v22, %v5234_v53  ;;  %v570_v22 = vadd.f32 %v5207_v37, %v5234_v53 }
 0x124   : > { %v955_v62 = vadd.f32 %v862_v46, %v557_v1  ;;  %v4318_v24 = vpop.f32.mrf.mxu0  ;;  %4533 = vmatmul.mubr.msk.bf16.gmra.mxu0 %vm304_vm1, %v3437_v11  ;;  %v3043_v34 = vpack.c.bf16 %v3015_v36, %v3014_v4  ;;  %v3413_v4 = vld [vmem:[%s4772_s7 + $0x9e] sm:$0xff]  ;;  %v3415_v36 = vld [vmem:[%s4772_s7 + $0xae] sm:$0xff]  ;;  %v568_v37 = vadd.f32 %v5234_v53, %v5216_v41 }
 0x125   : > { %v4284_v44 = vpop.f32.mrf.mxu1  ;;  %v5396_v40 = vadd.f32 %v4318_v24, %v956_v32  ;;  %4499 = vmatmul.mubr.msk.bf16.gmra.mxu1 %vm304_vm1, %v3041_v26  ;;  %4536 = vmatprep.mubr.msk.bf16.mxu0 %vm304_vm1, %v3438_v3  ;;  %v3440_v26 = vpack.c.bf16 %v3411_v52, %v3410_v9  ;;  %v561_v3 = vadd.f32 %v5234_v53, %v5178_v6  ;;  %v3020_v52 = vld [vmem:[%s4772_s7 + $0xc5] sm:$0xff] }
 0x126   : > { %v960_v30 = vadd.f32 %v4284_v44, %v562_v29  ;;  %v1257_v28 = vpop.f32.mrf.mxu0  ;;  %4502 = vmatprep.mubr.msk.bf16.mxu1 %vm304_vm1, %v3042_v23  ;;  %v3412_v44 = vld [vmem:[%s4772_s7 + $0x96] sm:$0xff] }
 0x127   : > { %v875_v32 = vpop.f32.mrf.mxu1  ;;  %v5409_v43 = vadd.f32 %v1257_v28, %v954_v60  ;;  %v3414_v28 = vld [vmem:[%s4772_s7 + $0xa6] sm:$0xff] }
 0x128   : > { %v958_v47 = vadd.f32 %v875_v32, %v560_v7  ;;  %v4319_v54 = vpop.f32.mrf.mxu0  ;;  %v3019_v7 = vld [vmem:[%s4772_s7 + $0xbd] sm:$0xff]  ;;  %v3021_v32 = vld [vmem:[%s4772_s7 + $0xcd] sm:$0xff] }
 0x129   : > { %v4285_v11 = vpop.f32.mrf.mxu1  ;;  %v5415_v48 = vadd.f32 %v4319_v54, %v957_v18  ;;  %v3441_v54 = vpack.c.bf16 %v3413_v4, %v3412_v44 }
 0x12a   : > { %v961_v60 = vadd.f32 %v4285_v11, %v563_v42  ;;  %v1260_v1 = vpop.f32.mrf.mxu0 }
 0x12b   : > { %v878_v23 = vpop.f32.mrf.mxu1  ;;  %v5419_v46 = vadd.f32 %v1260_v1, %v955_v62  ;;  %v3018_v62 = vld [vmem:[%s4772_s7 + $0xb5] sm:$0xff]  ;;  %v3046_v1 = vpack.c.bf16 %v3021_v32, %v3020_v52  ;;  %v571_v52 = vadd.f32 %v5222_v45, %v5234_v53 }
 0x12c   : > { %v959_v18 = vadd.f32 %v878_v23, %v561_v3  ;;  %v4322_v29 = vpop.f32.mrf.mxu0  ;;  %4537 = vmatmul.mubr.msk.bf16.gmra.mxu0 %vm304_vm1, %v3439_v61  ;;  %v3045_v11 = vpack.c.bf16 %v3019_v7, %v3018_v62  ;;  %v3417_v62 = vld [vmem:[%s4772_s7 + $0xbe] sm:$0xff]  ;;  %v3419_v7 = vld [vmem:[%s4772_s7 + $0xce] sm:$0xff] }
 0x12d   : > { %v4288_v24 = vpop.f32.mrf.mxu1  ;;  %v5424_v6 = vadd.f32 %v4322_v29, %v960_v30  ;;  %4503 = vmatmul.mubr.msk.bf16.gmra.mxu1 %vm304_vm1, %v3043_v34  ;;  %4540 = vmatprep.mubr.msk.bf16.mxu0 %vm304_vm1, %v3440_v26  ;;  %v3442_v34 = vpack.c.bf16 %v3415_v36, %v3414_v28  ;;  %v565_v26 = vadd.f32 %v5234_v53, %v5202_v33  ;;  %v3024_v36 = vld [vmem:[%s4772_s7 + $0xe5] sm:$0xff] }
 0x12e   : > { %v964_v25 = vadd.f32 %v4288_v24, %v566_v15  ;;  %v1273_v58 = vpop.f32.mrf.mxu0  ;;  %4506 = vmatprep.mubr.msk.bf16.mxu1 %vm304_vm1, %v3044_v10  ;;  %v3416_v24 = vld [vmem:[%s4772_s7 + $0xb6] sm:$0xff] }
 0x12f   : > { %v891_v30 = vpop.f32.mrf.mxu1  ;;  %v5437_v9 = vadd.f32 %v1273_v58, %v958_v47  ;;  %v3418_v58 = vld [vmem:[%s4772_s7 + $0xc6] sm:$0xff] }
 0x130   : > { %v962_v39 = vadd.f32 %v891_v30, %v564_v21  ;;  %v4323_v42 = vpop.f32.mrf.mxu0  ;;  %v3023_v21 = vld [vmem:[%s4772_s7 + $0xdd] sm:$0xff]  ;;  %v3025_v30 = vld [vmem:[%s4772_s7 + $0xed] sm:$0xff] }
 0x131   : > { %v4289_v61 = vpop.f32.mrf.mxu1  ;;  %v5443_v19 = vadd.f32 %v4323_v42, %v961_v60  ;;  %v3443_v42 = vpack.c.bf16 %v3417_v62, %v3416_v24  ;;  %v3027_v24 = vld [vmem:[%s4772_s7 + $0xfd] sm:$0xff]  ;;  %v3422_v62 = vld [vmem:[%s4772_s7 + $0xe6] sm:$0xff] }
 0x132   : > { %v965_v47 = vadd.f32 %v4289_v61, %v567_v35  ;;  %v1276_v3 = vpop.f32.mrf.mxu0 }
 0x133   : > { %v894_v10 = vpop.f32.mrf.mxu1  ;;  %v5447_v23 = vadd.f32 %v1276_v3, %v959_v18  ;;  %v3022_v18 = vld [vmem:[%s4772_s7 + $0xd5] sm:$0xff]  ;;  %v3048_v3 = vpack.c.bf16 %v3025_v30, %v3024_v36 }
 0x134   : > { %v963_v60 = vadd.f32 %v894_v10, %v565_v26  ;;  %v4326_v15 = vpop.f32.mrf.mxu0  ;;  %4541 = vmatmul.mubr.msk.bf16.gmra.mxu0 %vm304_vm1, %v3441_v54  ;;  %v3047_v61 = vpack.c.bf16 %v3023_v21, %v3022_v18 }
 0x135   : > { %v4292_v29 = vpop.f32.mrf.mxu1  ;;  %v5452_v33 = vadd.f32 %v4326_v15, %v964_v25  ;;  %4507 = vmatmul.mubr.msk.bf16.gmra.mxu1 %vm304_vm1, %v3045_v11  ;;  %4544 = vmatprep.mubr.msk.bf16.mxu0 %vm304_vm1, %v3442_v34  ;;  %v3444_v11 = vpack.c.bf16 %v3419_v7, %v3418_v58  ;;  %v3029_v58 = vld [vmem:[%s4772_s7 + $0x10d] sm:$0xff] }
 0x136   : > { %v968_v44 = vadd.f32 %v4292_v29, %v570_v22  ;;  %v1289_v4 = vpop.f32.mrf.mxu0  ;;  %4510 = vmatprep.mubr.msk.bf16.mxu1 %vm304_vm1, %v3046_v1  ;;  %v3421_v29 = vld [vmem:[%s4772_s7 + $0xde] sm:$0xff] }
 0x137   : > { %v907_v25 = vpop.f32.mrf.mxu1  ;;  %v5465_v28 = vadd.f32 %v1289_v4, %v962_v39  ;;  %v569_v39 = vadd.f32 %v5234_v53, %v5226_v51  ;;  %v3026_v51 = vld [vmem:[%s4772_s7 + $0xf5] sm:$0xff] }
 0x138   : > { %v966_v32 = vadd.f32 %v907_v25, %v568_v37  ;;  %v4327_v35 = vpop.f32.mrf.mxu0  ;;  %v3420_v53 = vld [vmem:[%s4772_s7 + $0xd6] sm:$0xff]  ;;  %v3423_v37 = vld [vmem:[%s4772_s7 + $0xee] sm:$0xff] }
 0x139   : > { %v4293_v54 = vpop.f32.mrf.mxu1  ;;  %v5471_v41 = vadd.f32 %v4327_v35, %v965_v47  ;;  %v3445_v36 = vpack.c.bf16 %v3421_v29, %v3420_v53  ;;  %v3446_v35 = vpack.c.bf16 %v3423_v37, %v3422_v62 }
 0x13a   : > { %v969_v34 = vadd.f32 %v4293_v54, %v571_v52  ;;  %v1292_v26 = vpop.f32.mrf.mxu0 }
 0x13b   : > { %v910_v1 = vpop.f32.mrf.mxu1  ;;  %v5475_v45 = vadd.f32 %v1292_v26, %v963_v60 }
 0x13c   : > { %v967_v10 = vadd.f32 %v910_v1, %v569_v39  ;;  %v4330_v47 = vpop.f32.mrf.mxu0  ;;  %4545 = vmatmul.mubr.msk.bf16.gmra.mxu0 %vm304_vm1, %v3443_v42  ;;  %v3425_v1 = vld [vmem:[%s4772_s7 + $0xfe] sm:$0xff] }
 0x13d   : > { %v4296_v22 = vpop.f32.mrf.mxu1  ;;  %v5478_v15 = vadd.f32 %v4330_v47, %v968_v44  ;;  %4511 = vmatmul.mubr.msk.bf16.gmra.mxu1 %vm304_vm1, %v3047_v61  ;;  %4548 = vmatprep.mubr.msk.bf16.mxu0 %vm304_vm1, %v3444_v11  ;;  %v3028_v44 = vld [vmem:[%s4772_s7 + $0x105] sm:$0xff] }
 0x13e   : > { %v972_v60 = vadd.f32 %v4296_v22, %v5239_v55  ;;  %v1305_v18 = vpop.f32.mrf.mxu0  ;;  %4514 = vmatprep.mubr.msk.bf16.mxu1 %vm304_vm1, %v3048_v3  ;;  %v3049_v55 = vpack.c.bf16 %v3027_v24, %v3026_v51  ;;  %v3050_v61 = vpack.c.bf16 %v3029_v58, %v3028_v44  ;;  %v3424_v3 = vld [vmem:[%s4772_s7 + $0xf6] sm:$0xff]  ;;  %v3426_v22 = vld [vmem:[%s4772_s7 + $0x106] sm:$0xff]  ;;  %v3427_v51 = vld [vmem:[%s4772_s7 + $0x10e] sm:$0xff] }
 0x13f   : > { %v923_v4 = vpop.f32.mrf.mxu1  ;;  %v5490_v21 = vadd.f32 %v1305_v18, %v966_v32  ;;  %v3033_v18 = vld [vmem:[%s4772_s7 + $0x12d] sm:$0xff]  ;;  %v3447_v37 = vpack.c.bf16 %v3425_v1, %v3424_v3  ;;  %v3448_v58 = vpack.c.bf16 %v3427_v51, %v3426_v22 }
 0x140   : > { %v970_v7 = vadd.f32 %v923_v4, %v5249_v63  ;;  %v4331_v25 = vpop.f32.mrf.mxu0 }
 0x141   : > { %v4297_v30 = vpop.f32.mrf.mxu1  ;;  %v5495_v52 = vadd.f32 %v4331_v25, %v969_v34 }
 0x142   : > { %v973_v42 = vadd.f32 %v4297_v30, %v5254_v59  ;;  %v1308_v54 = vpop.f32.mrf.mxu0  ;;  %v3030_v59 = vld [vmem:[%s4772_s7 + $0x115] sm:$0xff] }
 0x143   : > { %v926_v32 = vpop.f32.mrf.mxu1  ;;  %v5498_v11 = vadd.f32 %v1308_v54, %v967_v10 }
 0x144   : > { %v971_v63 = vadd.f32 %v926_v32, %v5261_v5  ;;  %v4334_v39 = vpop.f32.mrf.mxu0  ;;  %4549 = vmatmul.mubr.msk.bf16.gmra.mxu0 %vm304_vm1, %v3445_v36  ;;  %v3031_v5 = vld [vmem:[%s4772_s7 + $0x11d] sm:$0xff] }
 0x145   : > { %v5502_v34 = vadd.f32 %v4334_v39, %v972_v60  ;;  %v4340_v26 = vpop.f32.mrf.mxu1  ;;  %4515 = vmatmul.mubr.msk.bf16.gmra.mxu1 %vm304_vm1, %v3049_v55  ;;  %4552 = vmatprep.mubr.msk.bf16.mxu0 %vm304_vm1, %v3446_v35  ;;  %v3032_v60 = vld [vmem:[%s4772_s7 + $0x125] sm:$0xff] }
 0x146   : > { %v1736_v10 = vadd.f32 %v4340_v26, %v5288_v57  ;;  %v1321_v47 = vpop.f32.mrf.mxu0  ;;  %4518 = vmatprep.mubr.msk.bf16.mxu1 %vm304_vm1, %v3050_v61  ;;  %v3051_v57 = vpack.c.bf16 %v3031_v5, %v3030_v59  ;;  %v3428_v61 = vld [vmem:[%s4772_s7 + $0x116] sm:$0xff]  ;;  %v3429_v32 = vld [vmem:[%s4772_s7 + $0x11e] sm:$0xff]  ;;  %v3431_v59 = vld [vmem:[%s4772_s7 + $0x12e] sm:$0xff] }
 0x147   : > { %v5514_v53 = vadd.f32 %v1321_v47, %v970_v7  ;;  %v1591_v29 = vpop.f32.mrf.mxu1  ;;  %v3052_v7 = vpack.c.bf16 %v3033_v18, %v3032_v60  ;;  %v3035_v26 = vld [vmem:[%s4772_s7 + $0x13d] sm:$0xff]  ;;  %v3449_v5 = vpack.c.bf16 %v3429_v32, %v3428_v61 }
 0x148   : > { %v1734_v24 = vadd.f32 %v1591_v29, %v5297_v0  ;;  %v4335_v62 = vpop.f32.mrf.mxu0 }
 0x149   : > { %v5519_v4 = vadd.f32 %v4335_v62, %v973_v42  ;;  %v4341_v44 = vpop.f32.mrf.mxu1 }
 0x14a   : > { %v1737_v25 = vadd.f32 %v4341_v44, %v5303_v12  ;;  %v1324_v36 = vpop.f32.mrf.mxu0  ;;  %v3034_v12 = vld [vmem:[%s4772_s7 + $0x135] sm:$0xff] }
 0x14b   : > { %v5522_v30 = vadd.f32 %v1324_v36, %v971_v63  ;;  %v1594_v55 = vpop.f32.mrf.mxu1  ;;  %v3053_v29 = vpack.c.bf16 %v3035_v26, %v3034_v12 }
 0x14c   : > { %v1735_v0 = vadd.f32 %v1594_v55, %v5307_v27  ;;  %v4378_v35 = vpop.f32.mrf.mxu0  ;;  %4553 = vmatmul.mubr.msk.bf16.gmra.mxu0 %vm304_vm1, %v3447_v37  ;;  %v3430_v27 = vld [vmem:[%s4772_s7 + $0x126] sm:$0xff] }
 0x14d   : > { %v4344_v42 = vpop.f32.mrf.mxu1  ;;  %v5526_v54 = vadd.f32 %v4378_v35, %v1736_v10  ;;  %4519 = vmatmul.mubr.msk.bf16.gmra.mxu1 %vm304_vm1, %v3051_v57  ;;  %4556 = vmatprep.mubr.msk.bf16.mxu0 %vm304_vm1, %v3448_v58  ;;  %v3432_v58 = vld [vmem:[%s4772_s7 + $0x136] sm:$0xff] }
 0x14e   : > { %v1740_v63 = vadd.f32 %v4344_v42, %v5312_v31  ;;  %v1989_v39 = vpop.f32.mrf.mxu0  ;;  %4522 = vmatprep.mubr.msk.bf16.mxu1 %vm304_vm1, %v3052_v7  ;;  %v3450_v31 = vpack.c.bf16 %v3431_v59, %v3430_v27 }
 0x14f   : > { %v1607_v3 = vpop.f32.mrf.mxu1  ;;  %v5538_v1 = vadd.f32 %v1989_v39, %v1734_v24 }
 0x150   : > { %v1738_v10 = vadd.f32 %v1607_v3, %v5325_v20  ;;  %v4379_v47 = vpop.f32.mrf.mxu0 }
 0x151   : > { %v4345_v22 = vpop.f32.mrf.mxu1  ;;  %v5541_v51 = vadd.f32 %v4379_v47, %v1737_v25  ;;  %v3433_v25 = vld [vmem:[%s4772_s7 + $0x13e] sm:$0xff]  ;;  %s4578_s7 = smul.u32 4608, %s4726_s16  ;;  %s5841_s16 = scalar_lea.sflag [#allocation3], %s161_s4 }
 0x152   : > { %v1741_v60 = vadd.f32 %v4345_v22, %v5331_v38  ;;  %v1992_v18 = vpop.f32.mrf.mxu0  ;;  %v3451_v35 = vpack.c.bf16 %v3433_v25, %v3432_v58 }
 0x153   : > { %v1610_v62 = vpop.f32.mrf.mxu1  ;;  %v5544_v37 = vadd.f32 %v1992_v18, %v1735_v0  ;;  %s5833_s11 = scalar_lea.hbm %s5884_s3, %s4578_s7 }
 0x154   : > { %v1739_v24 = vadd.f32 %v1610_v62, %v5335_v8  ;;  %v4382_v44 = vpop.f32.mrf.mxu0  ;;  %4557 = vmatmul.mubr.msk.bf16.gmra.mxu0 %vm304_vm1, %v3449_v5 }
 0x155   : > { %v4348_v20 = vpop.f32.mrf.mxu1  ;;  %v5548_v57 = vadd.f32 %v4382_v44, %v1740_v63  ;;  %4523 = vmatmul.mubr.msk.bf16.gmra.mxu1 %vm304_vm1, %v3053_v29  ;;  %4560 = vmatprep.mubr.msk.bf16.mxu0 %vm304_vm1, %v3450_v31 }
 0x156   : > { %v1744_v38 = vadd.f32 %v4348_v20, %v5340_v49  ;;  %v2005_v36 = vpop.f32.mrf.mxu0 }
 0x157   : > { %v1623_v7 = vpop.f32.mrf.mxu1  ;;  %v5555_v55 = vadd.f32 %v2005_v36, %v1738_v10 }
 0x158   : > { %v1742_v8 = vadd.f32 %v1623_v7, %v5353_v50  ;;  %v4383_v0 = vpop.f32.mrf.mxu0 }
 0x159   : > { %v4349_v42 = vpop.f32.mrf.mxu1  ;;  %v5558_v12 = vadd.f32 %v4383_v0, %v1741_v60 }
 0x15a   : > { %v1745_v61 = vadd.f32 %v4349_v42, %v5359_v56  ;;  %v2008_v32 = vpop.f32.mrf.mxu0 }
 0x15b   : > { %v1626_v63 = vpop.f32.mrf.mxu1  ;;  %v5561_v39 = vadd.f32 %v2008_v32, %v1739_v24 }
 0x15c   : > { %v1743_v26 = vadd.f32 %v1626_v63, %v5363_v17  ;;  %v4386_v49 = vpop.f32.mrf.mxu0  ;;  %4561 = vmatmul.mubr.msk.bf16.gmra.mxu0 %vm304_vm1, %v3451_v35 }
 0x15d   : > { %v4352_v27 = vpop.f32.mrf.mxu1  ;;  %v5565_v59 = vadd.f32 %v4386_v49, %v1744_v38 }
 0x15e   : > { %v1748_v50 = vadd.f32 %v4352_v27, %v5368_v2  ;;  %v2021_v3 = vpop.f32.mrf.mxu0 }
 0x15f   : > { %v1639_v10 = vpop.f32.mrf.mxu1  ;;  %v5568_v47 = vadd.f32 %v2021_v3, %v1742_v8 }
 0x160   : > { %v1746_v56 = vadd.f32 %v1639_v10, %v5381_v14  ;;  %v4387_v5 = vpop.f32.mrf.mxu0 }
 0x161   : > { %v4353_v22 = vpop.f32.mrf.mxu1  ;;  %v5571_v29 = vadd.f32 %v4387_v5, %v1745_v61 }
 0x162   : > { %v1749_v17 = vadd.f32 %v4353_v22, %v5387_v13  ;;  %v2024_v31 = vpop.f32.mrf.mxu0 }
 0x163   : > { %v1642_v60 = vpop.f32.mrf.mxu1  ;;  %v5574_v18 = vadd.f32 %v2024_v31, %v1743_v26 }
 0x164   : > { %v1747_v62 = vadd.f32 %v1642_v60, %v5391_v16  ;;  %v4390_v24 = vpop.f32.mrf.mxu0 }
 0x165   : > { %v4356_v2 = vpop.f32.mrf.mxu1  ;;  %v5577_v44 = vadd.f32 %v4390_v24, %v1748_v50 }
 0x166   : > { %v1752_v20 = vadd.f32 %v4356_v2, %v5396_v40  ;;  %v2037_v58 = vpop.f32.mrf.mxu0 }
 0x167   : > { %v1655_v14 = vpop.f32.mrf.mxu1  ;;  %v5580_v25 = vadd.f32 %v2037_v58, %v1746_v56 }
 0x168   : > { %v1750_v38 = vadd.f32 %v1655_v14, %v5409_v43  ;;  %v4391_v36 = vpop.f32.mrf.mxu0 }
 0x169   : > { %v4357_v13 = vpop.f32.mrf.mxu1  ;;  %v5583_v7 = vadd.f32 %v4391_v36, %v1749_v17 }
 0x16a   : > { %v1753_v8 = vadd.f32 %v4357_v13, %v5415_v48  ;;  %v2040_v0 = vpop.f32.mrf.mxu0 }
 0x16b   : > { %v1658_v16 = vpop.f32.mrf.mxu1  ;;  %v5586_v35 = vadd.f32 %v2040_v0, %v1747_v62 }
 0x16c   : > { %v1751_v42 = vadd.f32 %v1658_v16, %v5419_v46  ;;  %v4394_v61 = vpop.f32.mrf.mxu0 }
 0x16d   : > { %v4360_v40 = vpop.f32.mrf.mxu1  ;;  %v5589_v32 = vadd.f32 %v4394_v61, %v1752_v20 }
 0x16e   : > { %v1756_v63 = vadd.f32 %v4360_v40, %v5424_v6  ;;  %v2053_v26 = vpop.f32.mrf.mxu0 }
 0x16f   : > { %v1671_v43 = vpop.f32.mrf.mxu1  ;;  %v5592_v49 = vadd.f32 %v2053_v26, %v1750_v38 }
 0x170   : > { %v1754_v27 = vadd.f32 %v1671_v43, %v5437_v9  ;;  %v4395_v50 = vpop.f32.mrf.mxu0 }
 0x171   : > { %v4361_v48 = vpop.f32.mrf.mxu1  ;;  %v5595_v3 = vadd.f32 %v4395_v50, %v1753_v8 }
 0x172   : > { %v1757_v10 = vadd.f32 %v4361_v48, %v5443_v19  ;;  %v2056_v56 = vpop.f32.mrf.mxu0 }
 0x173   : > { %v1674_v46 = vpop.f32.mrf.mxu1  ;;  %v5598_v5 = vadd.f32 %v2056_v56, %v1751_v42 }
 0x174   : > { %v1755_v22 = vadd.f32 %v1674_v46, %v5447_v23  ;;  %v4398_v17 = vpop.f32.mrf.mxu0 }
 0x175   : > { %v4364_v6 = vpop.f32.mrf.mxu1  ;;  %v5601_v31 = vadd.f32 %v4398_v17, %v1756_v63 }
 0x176   : > { %v1760_v60 = vadd.f32 %v4364_v6, %v5452_v33  ;;  %v2069_v62 = vpop.f32.mrf.mxu0 }
 0x177   : > { %v1687_v9 = vpop.f32.mrf.mxu1  ;;  %v5604_v24 = vadd.f32 %v2069_v62, %v1754_v27 }
 0x178   : > { %v1758_v2 = vadd.f32 %v1687_v9, %v5465_v28  ;;  %v4399_v20 = vpop.f32.mrf.mxu0 }
 0x179   : > { %v4365_v19 = vpop.f32.mrf.mxu1  ;;  %v5607_v58 = vadd.f32 %v4399_v20, %v1757_v10 }
 0x17a   : > { %v1761_v14 = vadd.f32 %v4365_v19, %v5471_v41  ;;  %v2072_v38 = vpop.f32.mrf.mxu0 }
 0x17b   : > { %v1690_v23 = vpop.f32.mrf.mxu1  ;;  %v5610_v36 = vadd.f32 %v2072_v38, %v1755_v22 }
 0x17c   : > { %v1759_v13 = vadd.f32 %v1690_v23, %v5475_v45  ;;  %v4402_v8 = vpop.f32.mrf.mxu0 }
 0x17d   : > { %v4368_v33 = vpop.f32.mrf.mxu1  ;;  %v5613_v0 = vadd.f32 %v4402_v8, %v1760_v60 }
 0x17e   : > { %v1764_v16 = vadd.f32 %v4368_v33, %v5478_v15  ;;  %v2085_v42 = vpop.f32.mrf.mxu0 }
 0x17f   : > { %v1703_v28 = vpop.f32.mrf.mxu1  ;;  %v5616_v61 = vadd.f32 %v2085_v42, %v1758_v2 }
 0x180   : > { %v1762_v40 = vadd.f32 %v1703_v28, %v5490_v21  ;;  %v4403_v63 = vpop.f32.mrf.mxu0 }
 0x181   : > { %v4369_v41 = vpop.f32.mrf.mxu1  ;;  %v5619_v26 = vadd.f32 %v4403_v63, %v1761_v14 }
 0x182   : > { %v1765_v43 = vadd.f32 %v4369_v41, %v5495_v52  ;;  %v2088_v27 = vpop.f32.mrf.mxu0 }
 0x183   : > { %v1706_v45 = vpop.f32.mrf.mxu1  ;;  %v5622_v50 = vadd.f32 %v2088_v27, %v1759_v13 }
 0x184   : > { %v1763_v48 = vadd.f32 %v1706_v45, %v5498_v11  ;;  %v4406_v10 = vpop.f32.mrf.mxu0 }
 0x185   : > { %v4372_v15 = vpop.f32.mrf.mxu1  ;;  %v5625_v56 = vadd.f32 %v4406_v10, %v1764_v16 }
 0x186   : > { %v1768_v46 = vadd.f32 %v4372_v15, %v5502_v34  ;;  %v2101_v22 = vpop.f32.mrf.mxu0 }
 0x187   : > { %v1719_v21 = vpop.f32.mrf.mxu1  ;;  %v5628_v17 = vadd.f32 %v2101_v22, %v1762_v40 }
 0x188   : > { %v1766_v6 = vadd.f32 %v1719_v21, %v5514_v53  ;;  %v4407_v60 = vpop.f32.mrf.mxu0 }
 0x189   : > { %v4373_v52 = vpop.f32.mrf.mxu1  ;;  %v5631_v62 = vadd.f32 %v4407_v60, %v1765_v43 }
 0x18a   : > { %v1769_v9 = vadd.f32 %v4373_v52, %v5519_v4  ;;  %v2104_v2 = vpop.f32.mrf.mxu0 }
 0x18b   : > { %v1722_v11 = vpop.f32.mrf.mxu1  ;;  %v5634_v20 = vadd.f32 %v2104_v2, %v1763_v48 }
 0x18c   : > { %v1767_v19 = vadd.f32 %v1722_v11, %v5522_v30  ;;  %v4410_v14 = vpop.f32.mrf.mxu0 }
 0x18d   : > { %v5637_v34 = vadd.f32 %v4410_v14, %v1768_v46  ;;  %v4416_v38 = vpop.f32.mrf.mxu1 }
 0x18e   : > { %v2532_v23 = vadd.f32 %v4416_v38, %v5526_v54  ;;  %v2117_v13 = vpop.f32.mrf.mxu0 }
 0x18f   : > { %v5640_v53 = vadd.f32 %v2117_v13, %v1766_v6  ;;  %v2387_v8 = vpop.f32.mrf.mxu1 }
 0x190   : > { %v2530_v33 = vadd.f32 %v2387_v8, %v5538_v1  ;;  %v4411_v16 = vpop.f32.mrf.mxu0 }
 0x191   : > { %v5643_v4 = vadd.f32 %v4411_v16, %v1769_v9  ;;  %v4417_v42 = vpop.f32.mrf.mxu1 }
 0x192   : > { %v2533_v28 = vadd.f32 %v4417_v42, %v5541_v51  ;;  %v2120_v40 = vpop.f32.mrf.mxu0 }
 0x193   : > { %v5646_v30 = vadd.f32 %v2120_v40, %v1767_v19  ;;  %v2390_v63 = vpop.f32.mrf.mxu1 }
 0x194   : > { %v2531_v41 = vadd.f32 %v2390_v63, %v5544_v37  ;;  %v4454_v43 = vpop.f32.mrf.mxu0 }
 0x195   : > { %v4420_v54 = vpop.f32.mrf.mxu1  ;;  %v5649_v27 = vadd.f32 %v4454_v43, %v2532_v23 }
 0x196   : > { %v2536_v45 = vadd.f32 %v4420_v54, %v5548_v57  ;;  %v2785_v48 = vpop.f32.mrf.mxu0 }
 0x197   : > { %v2403_v1 = vpop.f32.mrf.mxu1  ;;  %v5652_v10 = vadd.f32 %v2785_v48, %v2530_v33 }
 0x198   : > { %v2534_v15 = vadd.f32 %v2403_v1, %v5555_v55  ;;  %v4455_v46 = vpop.f32.mrf.mxu0 }
 0x199   : > { %v4421_v51 = vpop.f32.mrf.mxu1  ;;  %v5655_v22 = vadd.f32 %v4455_v46, %v2533_v28 }
 0x19a   : > { %v2537_v21 = vadd.f32 %v4421_v51, %v5558_v12  ;;  %v2788_v6 = vpop.f32.mrf.mxu0 }
 0x19b   : > { %v2406_v37 = vpop.f32.mrf.mxu1  ;;  %v5658_v60 = vadd.f32 %v2788_v6, %v2531_v41 }
 0x19c   : > { %v2535_v52 = vadd.f32 %v2406_v37, %v5561_v39  ;;  %v4458_v9 = vpop.f32.mrf.mxu0 }
 0x19d   : > { %v4424_v57 = vpop.f32.mrf.mxu1  ;;  %v5661_v2 = vadd.f32 %v4458_v9, %v2536_v45 }
 0x19e   : > { %v2540_v11 = vadd.f32 %v4424_v57, %v5565_v59  ;;  %v2801_v19 = vpop.f32.mrf.mxu0 }
 0x19f   : > { %v2419_v55 = vpop.f32.mrf.mxu1  ;;  %v5664_v14 = vadd.f32 %v2801_v19, %v2534_v15 }
 0x1a0   : > { %v2538_v38 = vadd.f32 %v2419_v55, %v5568_v47  ;;  %v4459_v23 = vpop.f32.mrf.mxu0 }
 0x1a1   : > { %v4425_v12 = vpop.f32.mrf.mxu1  ;;  %v5667_v13 = vadd.f32 %v4459_v23, %v2537_v21 }
 0x1a2   : > { %v2541_v8 = vadd.f32 %v4425_v12, %v5571_v29  ;;  %v2804_v33 = vpop.f32.mrf.mxu0 }
 0x1a3   : > { %v2422_v39 = vpop.f32.mrf.mxu1  ;;  %v5670_v16 = vadd.f32 %v2804_v33, %v2535_v52 }
 0x1a4   : > { %v2539_v42 = vadd.f32 %v2422_v39, %v5574_v18  ;;  %v4462_v28 = vpop.f32.mrf.mxu0 }
 0x1a5   : > { %v4428_v59 = vpop.f32.mrf.mxu1  ;;  %v5673_v40 = vadd.f32 %v4462_v28, %v2540_v11 }
 0x1a6   : > { %v2544_v63 = vadd.f32 %v4428_v59, %v5577_v44  ;;  %v2817_v41 = vpop.f32.mrf.mxu0 }
 0x1a7   : > { %v2435_v47 = vpop.f32.mrf.mxu1  ;;  %v5676_v43 = vadd.f32 %v2817_v41, %v2538_v38 }
 0x1a8   : > { %v2542_v54 = vadd.f32 %v2435_v47, %v5580_v25  ;;  %v4463_v45 = vpop.f32.mrf.mxu0 }
 0x1a9   : > { %v4429_v29 = vpop.f32.mrf.mxu1  ;;  %v5679_v48 = vadd.f32 %v4463_v45, %v2541_v8 }
 0x1aa   : > { %v2545_v1 = vadd.f32 %v4429_v29, %v5583_v7  ;;  %v2820_v15 = vpop.f32.mrf.mxu0 }
 0x1ab   : > { %v2438_v18 = vpop.f32.mrf.mxu1  ;;  %v5682_v46 = vadd.f32 %v2820_v15, %v2539_v42 }
 0x1ac   : > { %v2543_v51 = vadd.f32 %v2438_v18, %v5586_v35  ;;  %v4466_v21 = vpop.f32.mrf.mxu0 }
 0x1ad   : > { %v4432_v44 = vpop.f32.mrf.mxu1  ;;  %v5685_v6 = vadd.f32 %v4466_v21, %v2544_v63 }
 0x1ae   : > { %v2548_v37 = vadd.f32 %v4432_v44, %v5589_v32  ;;  %v2833_v52 = vpop.f32.mrf.mxu0 }
 0x1af   : > { %v2451_v25 = vpop.f32.mrf.mxu1  ;;  %v5688_v9 = vadd.f32 %v2833_v52, %v2542_v54 }
 0x1b0   : > { %v2546_v57 = vadd.f32 %v2451_v25, %v5592_v49  ;;  %v4467_v11 = vpop.f32.mrf.mxu0 }
 0x1b1   : > { %v4433_v7 = vpop.f32.mrf.mxu1  ;;  %v5691_v19 = vadd.f32 %v4467_v11, %v2545_v1 }
 0x1b2   : > { %v2549_v55 = vadd.f32 %v4433_v7, %v5595_v3  ;;  %v2836_v38 = vpop.f32.mrf.mxu0 }
 0x1b3   : > { %v2454_v35 = vpop.f32.mrf.mxu1  ;;  %v5694_v23 = vadd.f32 %v2836_v38, %v2543_v51 }
 0x1b4   : > { %v2547_v12 = vadd.f32 %v2454_v35, %v5598_v5  ;;  %v4470_v8 = vpop.f32.mrf.mxu0 }
 0x1b5   : > { %v4436_v32 = vpop.f32.mrf.mxu1  ;;  %v5697_v33 = vadd.f32 %v4470_v8, %v2548_v37 }
 0x1b6   : > { %v2552_v39 = vadd.f32 %v4436_v32, %v5601_v31  ;;  %v2849_v42 = vpop.f32.mrf.mxu0 }
 0x1b7   : > { %v2467_v49 = vpop.f32.mrf.mxu1  ;;  %v5700_v28 = vadd.f32 %v2849_v42, %v2546_v57 }
 0x1b8   : > { %v2550_v59 = vadd.f32 %v2467_v49, %v5604_v24  ;;  %v4471_v63 = vpop.f32.mrf.mxu0 }
 0x1b9   : > { %v4437_v3 = vpop.f32.mrf.mxu1  ;;  %v5703_v41 = vadd.f32 %v4471_v63, %v2549_v55 }
 0x1ba   : > { %v2553_v47 = vadd.f32 %v4437_v3, %v5607_v58  ;;  %v2852_v54 = vpop.f32.mrf.mxu0 }
 0x1bb   : > { %v2470_v5 = vpop.f32.mrf.mxu1  ;;  %v5706_v45 = vadd.f32 %v2852_v54, %v2547_v12 }
 0x1bc   : > { %v2551_v29 = vadd.f32 %v2470_v5, %v5610_v36  ;;  %v4474_v1 = vpop.f32.mrf.mxu0 }
 0x1bd   : > { %v4440_v31 = vpop.f32.mrf.mxu1  ;;  %v5709_v15 = vadd.f32 %v4474_v1, %v2552_v39 }
 0x1be   : > { %v2556_v18 = vadd.f32 %v4440_v31, %v5613_v0  ;;  %v2865_v51 = vpop.f32.mrf.mxu0 }
 0x1bf   : > { %v2483_v24 = vpop.f32.mrf.mxu1  ;;  %v5712_v21 = vadd.f32 %v2865_v51, %v2550_v59 }
 0x1c0   : > { %v2554_v44 = vadd.f32 %v2483_v24, %v5616_v61  ;;  %v4475_v37 = vpop.f32.mrf.mxu0 }
 0x1c1   : > { %v4441_v58 = vpop.f32.mrf.mxu1  ;;  %v5715_v52 = vadd.f32 %v4475_v37, %v2553_v47 }
 0x1c2   : > { %v2557_v25 = vadd.f32 %v4441_v58, %v5619_v26  ;;  %v2868_v57 = vpop.f32.mrf.mxu0 }
 0x1c3   : > { %v2486_v36 = vpop.f32.mrf.mxu1  ;;  %v5718_v11 = vadd.f32 %v2868_v57, %v2551_v29 }
 0x1c4   : > { %v2555_v7 = vadd.f32 %v2486_v36, %v5622_v50  ;;  %v4478_v55 = vpop.f32.mrf.mxu0 }
 0x1c5   : > { %v4444_v0 = vpop.f32.mrf.mxu1  ;;  %v5721_v38 = vadd.f32 %v4478_v55, %v2556_v18 }
 0x1c6   : > { %v2560_v35 = vadd.f32 %v4444_v0, %v5625_v56  ;;  %v2881_v12 = vpop.f32.mrf.mxu0 }
 0x1c7   : > { %v2499_v61 = vpop.f32.mrf.mxu1  ;;  %v5724_v8 = vadd.f32 %v2881_v12, %v2554_v44 }
 0x1c8   : > { %v2558_v32 = vadd.f32 %v2499_v61, %v5628_v17  ;;  %v4479_v39 = vpop.f32.mrf.mxu0 }
 0x1c9   : > { %v4445_v26 = vpop.f32.mrf.mxu1  ;;  %v5727_v42 = vadd.f32 %v4479_v39, %v2557_v25 }
 0x1ca   : > { %v2561_v49 = vadd.f32 %v4445_v26, %v5631_v62  ;;  %v2884_v59 = vpop.f32.mrf.mxu0 }
 0x1cb   : > { %v2502_v50 = vpop.f32.mrf.mxu1  ;;  %v5730_v63 = vadd.f32 %v2884_v59, %v2555_v7 }
 0x1cc   : > { %v2559_v3 = vadd.f32 %v2502_v50, %v5634_v20  ;;  %v4482_v47 = vpop.f32.mrf.mxu0 }
 0x1cd   : > { %v4448_v56 = vpop.f32.mrf.mxu1  ;;  %v5733_v54 = vadd.f32 %v4482_v47, %v2560_v35 }
 0x1ce   : > { %v2564_v5 = vadd.f32 %v4448_v56, %v5637_v34  ;;  %v2897_v17 = vpop.f32.mrf.mxu0 }
 0x1cf   : > { %v2515_v29 = vpop.f32.mrf.mxu1  ;;  %v5736_v1 = vadd.f32 %v2897_v17, %v2558_v32 }
 0x1d0   : > { %v2562_v31 = vadd.f32 %v2515_v29, %v5640_v53  ;;  %v4483_v62 = vpop.f32.mrf.mxu0 }
 0x1d1   : > { %v4449_v18 = vpop.f32.mrf.mxu1  ;;  %v5739_v51 = vadd.f32 %v4483_v62, %v2561_v49 }
 0x1d2   : > { %v2565_v20 = vadd.f32 %v4449_v18, %v5643_v4  ;;  %v2900_v24 = vpop.f32.mrf.mxu0 }
 0x1d3   : > { %v2518_v44 = vpop.f32.mrf.mxu1  ;;  %v5742_v37 = vadd.f32 %v2900_v24, %v2559_v3 }
 0x1d4   : > { %v2563_v58 = vadd.f32 %v2518_v44, %v5646_v30  ;;  %v4486_v34 = vpop.f32.mrf.mxu0 }
 0x1d5   : > { %v5746_v25 = vadd.f32 %v4486_v34, %v2564_v5  ;;  %v4492_v57 = vpop.f32.mrf.mxu1 }
 0x1d6   : > { %v2913_v36 = vpop.f32.mrf.mxu0  ;;  %v3328_v12 = vadd.f32 %v4492_v57, %v5649_v27 }
 0x1d7   : > { %v5748_v53 = vadd.f32 %v2913_v36, %v2562_v31  ;;  %v3183_v7 = vpop.f32.mrf.mxu1 }
 0x1d8   : > { %v4487_v55 = vpop.f32.mrf.mxu0  ;;  %v3326_v39 = vadd.f32 %v3183_v7, %v5652_v10 }
 0x1d9   : > { %v5752_v0 = vadd.f32 %v4487_v55, %v2565_v20  ;;  %v4493_v4 = vpop.f32.mrf.mxu1 }
 0x1da   : > { %v2916_v35 = vpop.f32.mrf.mxu0  ;;  %v3329_v50 = vadd.f32 %v4493_v4, %v5655_v22 }
 0x1db   : > { %v5755_v61 = vadd.f32 %v2916_v35, %v2563_v58  ;;  %v3186_v30 = vpop.f32.mrf.mxu1 }
 0x1dc   : > { %v4530_v32 = vpop.f32.mrf.mxu0  ;;  %v3327_v56 = vadd.f32 %v3186_v30, %v5658_v60 }
 0x1dd   : > { %v4496_v26 = vpop.f32.mrf.mxu1  ;;  %v3726_v49 = vadd.f32 %v4530_v32, %v3328_v12 }
 0x1de   : > { %v3581_v59 = vpop.f32.mrf.mxu0  ;;  %v3332_v29 = vadd.f32 %v4496_v26, %v5661_v2 }
 0x1df   : > { %3762 = vst [vmem:[%s5759_s6 + $0x10] sm:$0xff] %v3726_v49  ;;  %v3199_v3 = vpop.f32.mrf.mxu1  ;;  %v3724_v27 = vadd.f32 %v3581_v59, %v3326_v39 }
 0x1e0   : > { %v4531_v47 = vpop.f32.mrf.mxu0  ;;  %v3330_v18 = vadd.f32 %v3199_v3, %v5664_v14 }
 0x1e1   : > { %3760 = vst [vmem:[%s5759_s6] sm:$0xff] %v3724_v27  ;;  %v4497_v10 = vpop.f32.mrf.mxu1  ;;  %v3727_v5 = vadd.f32 %v4531_v47, %v3329_v50 }
 0x1e2   : > { %v3584_v17 = vpop.f32.mrf.mxu0  ;;  %v3333_v60 = vadd.f32 %v4497_v10, %v5667_v13 }
 0x1e3   : > { %3763 = vst [vmem:[%s5759_s6 + $0x18] sm:$0xff] %v3727_v5  ;;  %v3202_v22 = vpop.f32.mrf.mxu1  ;;  %v3725_v31 = vadd.f32 %v3584_v17, %v3327_v56 }
 0x1e4   : > { %v4534_v62 = vpop.f32.mrf.mxu0  ;;  %v3331_v2 = vadd.f32 %v3202_v22, %v5670_v16 }
 0x1e5   : > { %3761 = vst [vmem:[%s5759_s6 + $0x8] sm:$0xff] %v3725_v31  ;;  %v4500_v20 = vpop.f32.mrf.mxu1  ;;  %v3730_v24 = vadd.f32 %v4534_v62, %v3332_v29 }
 0x1e6   : > { %v3597_v44 = vpop.f32.mrf.mxu0  ;;  %v3336_v14 = vadd.f32 %v4500_v20, %v5673_v40 }
 0x1e7   : > { %3766 = vst [vmem:[%s5759_s6 + $0x30] sm:$0xff] %v3730_v24  ;;  %v3215_v58 = vpop.f32.mrf.mxu1  ;;  %v3728_v34 = vadd.f32 %v3597_v44, %v3330_v18 }
 0x1e8   : > { %v4535_v57 = vpop.f32.mrf.mxu0  ;;  %v3334_v13 = vadd.f32 %v3215_v58, %v5676_v43 }
 0x1e9   : > { %3764 = vst [vmem:[%s5759_s6 + $0x20] sm:$0xff] %v3728_v34  ;;  %v4501_v36 = vpop.f32.mrf.mxu1  ;;  %v3731_v7 = vadd.f32 %v4535_v57, %v3333_v60 }
 0x1ea   : > { %v3600_v55 = vpop.f32.mrf.mxu0  ;;  %v3337_v16 = vadd.f32 %v4501_v36, %v5679_v48 }
 0x1eb   : > { %3767 = vst [vmem:[%s5759_s6 + $0x38] sm:$0xff] %v3731_v7  ;;  %v3218_v4 = vpop.f32.mrf.mxu1  ;;  %v3729_v35 = vadd.f32 %v3600_v55, %v3331_v2 }
 0x1ec   : > { %v4538_v12 = vpop.f32.mrf.mxu0  ;;  %v3335_v40 = vadd.f32 %v3218_v4, %v5682_v46 }
 0x1ed   : > { %3765 = vst [vmem:[%s5759_s6 + $0x28] sm:$0xff] %v3729_v35  ;;  %v4504_v30 = vpop.f32.mrf.mxu1  ;;  %v3734_v32 = vadd.f32 %v4538_v12, %v3336_v14 }
 0x1ee   : > { %v3613_v39 = vpop.f32.mrf.mxu0  ;;  %v3340_v43 = vadd.f32 %v4504_v30, %v5685_v6 }
 0x1ef   : > { %3770 = vst [vmem:[%s5759_s6 + $0x50] sm:$0xff] %v3734_v32  ;;  %v3231_v26 = vpop.f32.mrf.mxu1  ;;  %v3732_v49 = vadd.f32 %v3613_v39, %v3334_v13 }
 0x1f0   : > { %v4539_v59 = vpop.f32.mrf.mxu0  ;;  %v3338_v48 = vadd.f32 %v3231_v26, %v5688_v9 }
 0x1f1   : > { %3768 = vst [vmem:[%s5759_s6 + $0x40] sm:$0xff] %v3732_v49  ;;  %v4505_v50 = vpop.f32.mrf.mxu1  ;;  %v3735_v3 = vadd.f32 %v4539_v59, %v3337_v16 }
 0x1f2   : > { %v3616_v27 = vpop.f32.mrf.mxu0  ;;  %v3341_v46 = vadd.f32 %v4505_v50, %v5691_v19 }
 0x1f3   : > { %3771 = vst [vmem:[%s5759_s6 + $0x58] sm:$0xff] %v3735_v3  ;;  %v3234_v47 = vpop.f32.mrf.mxu1  ;;  %v3733_v56 = vadd.f32 %v3616_v27, %v3335_v40 }
 0x1f4   : > { %v4542_v10 = vpop.f32.mrf.mxu0  ;;  %v3339_v6 = vadd.f32 %v3234_v47, %v5694_v23 }
 0x1f5   : > { %3769 = vst [vmem:[%s5759_s6 + $0x48] sm:$0xff] %v3733_v56  ;;  %v4508_v5 = vpop.f32.mrf.mxu1  ;;  %v3738_v17 = vadd.f32 %v4542_v10, %v3340_v43 }
 0x1f6   : > { %v3629_v29 = vpop.f32.mrf.mxu0  ;;  %v3344_v9 = vadd.f32 %v4508_v5, %v5697_v33 }
 0x1f7   : > { %3774 = vst [vmem:[%s5759_s6 + $0x70] sm:$0xff] %v3738_v17  ;;  %v3247_v22 = vpop.f32.mrf.mxu1  ;;  %v3736_v31 = vadd.f32 %v3629_v29, %v3338_v48 }
 0x1f8   : > { %v4543_v62 = vpop.f32.mrf.mxu0  ;;  %v3342_v19 = vadd.f32 %v3247_v22, %v5700_v28 }
 0x1f9   : > { %3772 = vst [vmem:[%s5759_s6 + $0x60] sm:$0xff] %v3736_v31  ;;  %v4509_v18 = vpop.f32.mrf.mxu1  ;;  %v3739_v20 = vadd.f32 %v4543_v62, %v3341_v46 }
 0x1fa   : > { %v3632_v24 = vpop.f32.mrf.mxu0  ;;  %v3345_v23 = vadd.f32 %v4509_v18, %v5703_v41 }
 0x1fb   : > { %3775 = vst [vmem:[%s5759_s6 + $0x78] sm:$0xff] %v3739_v20  ;;  %v3250_v44 = vpop.f32.mrf.mxu1  ;;  %v3737_v60 = vadd.f32 %v3632_v24, %v3339_v6 }
 0x1fc   : > { %v4546_v58 = vpop.f32.mrf.mxu0  ;;  %v3343_v33 = vadd.f32 %v3250_v44, %v5706_v45 }
 0x1fd   : > { %3773 = vst [vmem:[%s5759_s6 + $0x68] sm:$0xff] %v3737_v60  ;;  %v4512_v34 = vpop.f32.mrf.mxu1  ;;  %v3742_v57 = vadd.f32 %v4546_v58, %v3344_v9 }
 0x1fe   : > { %v3645_v2 = vpop.f32.mrf.mxu0  ;;  %v3348_v28 = vadd.f32 %v4512_v34, %v5709_v15 }
 0x1ff   : > { %3778 = vst [vmem:[%s5759_s6 + $0x90] sm:$0xff] %v3742_v57  ;;  %v3263_v36 = vpop.f32.mrf.mxu1  ;;  %v3740_v7 = vadd.f32 %v3645_v2, %v3342_v19 }
 0x200   : > { %v4547_v55 = vpop.f32.mrf.mxu0  ;;  %v3346_v41 = vadd.f32 %v3263_v36, %v5712_v21 }
 0x201   : > { %3776 = vst [vmem:[%s5759_s6 + $0x80] sm:$0xff] %v3740_v7  ;;  %v4513_v14 = vpop.f32.mrf.mxu1  ;;  %v3743_v4 = vadd.f32 %v4547_v55, %v3345_v23 }
 0x202   : > { %v3648_v35 = vpop.f32.mrf.mxu0  ;;  %v3349_v45 = vadd.f32 %v4513_v14, %v5715_v52 }
 0x203   : > { %3779 = vst [vmem:[%s5759_s6 + $0x98] sm:$0xff] %v3743_v4  ;;  %v3266_v12 = vpop.f32.mrf.mxu1  ;;  %v3741_v13 = vadd.f32 %v3648_v35, %v3343_v33 }
 0x204   : > { %v4550_v30 = vpop.f32.mrf.mxu0  ;;  %v3347_v15 = vadd.f32 %v3266_v12, %v5718_v11 }
 0x205   : > { %3777 = vst [vmem:[%s5759_s6 + $0x88] sm:$0xff] %v3741_v13  ;;  %v4516_v32 = vpop.f32.mrf.mxu1  ;;  %v3746_v39 = vadd.f32 %v4550_v30, %v3348_v28 }
 0x206   : > { %v3661_v16 = vpop.f32.mrf.mxu0  ;;  %v3352_v21 = vadd.f32 %v4516_v32, %v5721_v38 }
 0x207   : > { %3782 = vst [vmem:[%s5759_s6 + $0xb0] sm:$0xff] %v3746_v39  ;;  %v3279_v26 = vpop.f32.mrf.mxu1  ;;  %v3744_v49 = vadd.f32 %v3661_v16, %v3346_v41 }
 0x208   : > { %v4551_v59 = vpop.f32.mrf.mxu0  ;;  %v3350_v52 = vadd.f32 %v3279_v26, %v5724_v8 }
 0x209   : > { %3780 = vst [vmem:[%s5759_s6 + $0xa0] sm:$0xff] %v3744_v49  ;;  %v4517_v40 = vpop.f32.mrf.mxu1  ;;  %v3747_v50 = vadd.f32 %v4551_v59, %v3349_v45 }
 0x20a   : > { %v3664_v3 = vpop.f32.mrf.mxu0  ;;  %v3353_v11 = vadd.f32 %v4517_v40, %v5727_v42 }
 0x20b   : > { %3783 = vst [vmem:[%s5759_s6 + $0xb8] sm:$0xff] %v3747_v50  ;;  %v3282_v27 = vpop.f32.mrf.mxu1  ;;  %v3745_v43 = vadd.f32 %v3664_v3, %v3347_v15 }
 0x20c   : > { %v4554_v47 = vpop.f32.mrf.mxu0  ;;  %v3351_v38 = vadd.f32 %v3282_v27, %v5730_v63 }
 0x20d   : > { %3781 = vst [vmem:[%s5759_s6 + $0xa8] sm:$0xff] %v3745_v43  ;;  %v4520_v56 = vpop.f32.mrf.mxu1  ;;  %v3750_v10 = vadd.f32 %v4554_v47, %v3352_v21 }
 0x20e   : > { %v3677_v48 = vpop.f32.mrf.mxu0  ;;  %v3356_v8 = vadd.f32 %v4520_v56, %v5733_v54 }
 0x20f   : > { %3786 = vst [vmem:[%s5759_s6 + $0xd0] sm:$0xff] %v3750_v10  ;;  %v3295_v5 = vpop.f32.mrf.mxu1  ;;  %v3748_v17 = vadd.f32 %v3677_v48, %v3350_v52 }
 0x210   : > { %v4555_v29 = vpop.f32.mrf.mxu0  ;;  %v3354_v42 = vadd.f32 %v3295_v5, %v5736_v1 }
 0x211   : > { %3784 = vst [vmem:[%s5759_s6 + $0xc0] sm:$0xff] %v3748_v17  ;;  %v4521_v46 = vpop.f32.mrf.mxu1  ;;  %v3751_v22 = vadd.f32 %v4555_v29, %v3353_v11 }
 0x212   : > { %v3680_v31 = vpop.f32.mrf.mxu0  ;;  %v3357_v63 = vadd.f32 %v4521_v46, %v5739_v51 }
 0x213   : > { %3787 = vst [vmem:[%s5759_s6 + $0xd8] sm:$0xff] %v3751_v22  ;;  %v3298_v62 = vpop.f32.mrf.mxu1  ;;  %v3749_v6 = vadd.f32 %v3680_v31, %v3351_v38 }
 0x214   : > { %v4558_v18 = vpop.f32.mrf.mxu0  ;;  %v3355_v58 = vadd.f32 %v3298_v62, %v5742_v37 }
 0x215   : > { %3785 = vst [vmem:[%s5759_s6 + $0xc8] sm:$0xff] %v3749_v6  ;;  %v4524_v20 = vpop.f32.mrf.mxu1  ;;  %v3754_v24 = vadd.f32 %v4558_v18, %v3356_v8 }
 0x216   : > { %v3693_v9 = vpop.f32.mrf.mxu0  ;;  %v3360_v57 = vadd.f32 %v4524_v20, %v5746_v25 }
 0x217   : > { %3790 = vst [vmem:[%s5759_s6 + $0xf0] sm:$0xff] %v3754_v24  ;;  %v3311_v44 = vpop.f32.mrf.mxu1  ;;  %v3752_v60 = vadd.f32 %v3693_v9, %v3354_v42 }
 0x218   : > { %v4559_v54 = vpop.f32.mrf.mxu0  ;;  %v3358_v51 = vadd.f32 %v3311_v44, %v5748_v53 }
 0x219   : > { %3788 = vst [vmem:[%s5759_s6 + $0xe0] sm:$0xff] %v3752_v60  ;;  %v3755_v19 = vadd.f32 %v4559_v54, %v3357_v63  ;;  %v4525_v1 = vpop.f32.mrf.mxu1 }
 0x21a   : > { %v3696_v34 = vpop.f32.mrf.mxu0  ;;  %v3361_v55 = vadd.f32 %v4525_v1, %v5752_v0 }
 0x21b   : > { %3791 = vst [vmem:[%s5759_s6 + $0xf8] sm:$0xff] %v3755_v19  ;;  %v3753_v2 = vadd.f32 %v3696_v34, %v3355_v58  ;;  %v3314_v7 = vpop.f32.mrf.mxu1 }
 0x21c   : > { %v4562_v23 = vpop.f32.mrf.mxu0  ;;  %v3359_v14 = vadd.f32 %v3314_v7, %v5755_v61 }
 0x21d   : > { %3789 = vst [vmem:[%s5759_s6 + $0xe8] sm:$0xff] %v3753_v2  ;;  %v3758_v36 = vadd.f32 %v4562_v23, %v3360_v57 }
 0x21e   : > { %v3709_v37 = vpop.f32.mrf.mxu0 }
 0x21f   : > { %3794 = vst [vmem:[%s5759_s6 + $0x110] sm:$0xff] %v3758_v36  ;;  %v3756_v33 = vadd.f32 %v3709_v37, %v3358_v51 }
 0x220   : > { %v4563_v25 = vpop.f32.mrf.mxu0 }
 0x221   : > { %3792 = vst [vmem:[%s5759_s6 + $0x100] sm:$0xff] %v3756_v33  ;;  %v3759_v4 = vadd.f32 %v4563_v25, %v3361_v55 }
 0x222   : > { %v3712_v53 = vpop.f32.mrf.mxu0 }
 0x223   : > { %3795 = vst [vmem:[%s5759_s6 + $0x118] sm:$0xff] %v3759_v4  ;;  %v3757_v0 = vadd.f32 %v3712_v53, %v3359_v14 }
 0x225   : > { %3793 = vst [vmem:[%s5759_s6 + $0x108] sm:$0xff] %v3757_v0 }
 0x226   : > { %4633 = shalt.err (!%p4630_p3)
}
 0x227   : > { %s4634_s25 = scalar_lea.hbm %s5833_s11, 4608  ;;  %s4638_s28 = scalar_lea.hbm %s5884_s3, 9216 }
 0x228   : > { %p4635_p4 = scmp.ne.s32.totalorder %s5833_s11, %s4634_s25  ;;  %p4639_p9 = scmp.lt.s32.totalorder %s5833_s11, %s5884_s3 }
 0x229   : > { %p4640_p10 = scmp.lt.s32.totalorder %s4638_s28, %s4634_s25 }
 0x22a   : > { %p4636_p7 = pnand %p4635_p4, %p4743_p5 }
 0x22b   : > { %p4641_p11 = por %p4640_p10, %p4639_p9 }
 0x22c   : > { %p4637_p8 = pneg %p4636_p7 }
 0x22e   : > { %p4642_p12 = pnand %p4641_p11, %p4637_p8 }
 0x230   : > { %4645 = shalt.err (!%p4642_p12)
}
 0x231   : > { %s4683_s4 = smov 128   ;;  %s4684_s5 = smov 8  }
 0x232   : > { %4579 = dma.vmem_to_hbm [thread:$0]  (%p4743_p5), %s5835_s8, 4608, %s5833_s11, %s5841_s16, %s4683_s4, %s4683_s4, %s4684_s5  }
 0x233 PF: > { %p4585_p13 = scmp.ge.s32.totalorder %s4680_s15, 2  ;;  %s3825_s6 = sand.u32 1, %s4668_s12  }
 0x234   : > { %s3826_s7 = scalar_lea.sflag [#allocation3], %s3825_s6 }
 0x235   : > { %p4582_p0 = pnand %p4585_p13, %p4747_p6 }
 0x237   : > { %p4583_p1 = pneg %p4582_p0 }
 0x239   : > { %4663 = dma.done.wait (%p4583_p1), %s3826_s7, 4608  }
 0x23a   : > { %4665 = vsyncadd (%p4583_p1), %s3826_s7, 4294962688  ;;  %p13_p2 = scmp.ge.s32.totalorder %s4730_s18, 4   ;;  %s5887_s12 = smov %s4672_s13 }
 0x23b   : > { %s5888_s13 = smov %s4676_s14  ;;  %s5889_s14 = smov %s4741_s21 }
 0x23c   : > { %s5890_s15 = smov %s4730_s18  ;;  %15 = sbr.rel (!%p13_p2) target bundleno = 3 (0x3), region = 75 }
 0x241   :  { %3831 = vsyncpa [#allocation3], 1 }
 0x242   :  { %3833 = vsyncpa [#allocation3 + $0x1], 1 }

</bundles_post_ra>
